<compile_context>
chip_gen: v5e
topology: v5e:2x2
jax: 0.10.0
libtpu: 0.0.40
codegen_flags: <defaults>
</compile_context>

<pallas_src>
import numpy as np
import jax
import jax.numpy as jnp
from jax import lax
from jax.experimental import pallas as pl
from jax.experimental.pallas import tpu as pltpu


# ------------------------- flat-coordinate geometry -------------------------
# layer 1: 28x28 input, zero-pad 1  -> padded width 30
_WP1 = 30
_Q1 = 27 * _WP1 + 28          # 838: conv1 output width in padded-flat coords
_M1 = 26 * _WP1 + 26 + 1      # 807: width consumed by the 2x2 pool max
# layer 2: 14x14 input, zero-pad 1  -> padded width 16
_WP2 = 16
_Q2 = 13 * _WP2 + 14          # 222: conv2 output width in padded-flat coords
_M2 = 12 * _WP2 + 12 + 1      # 205: width consumed by the 2x2 pool max


def _build_s1():
    """(807, 256) 0/1: pool-1 select (even/even of the 28x28 map, width-30 flat
    coords) and embed into the zero-padded width-16 flat layout of conv2."""
    s = np.zeros((_M1, _WP2 * _WP2), np.float32)
    for y in range(14):
        for x in range(14):
            s[(2 * y) * _WP1 + 2 * x, (y + 1) * _WP2 + (x + 1)] = 1.0
    return s


def _build_s2():
    """(205, 49) 0/1: pool-2 select (even/even of the 14x14 map, width-16 flat
    coords) in row-major (y, x) order -> matches torch per-channel flatten."""
    s = np.zeros((_M2, 49), np.float32)
    for y in range(7):
        for x in range(7):
            s[(2 * y) * _WP2 + 2 * x, y * 7 + x] = 1.0
    return s


_S1 = _build_s1()
_S2 = _build_s2()


# ------------------------------ fused kernel --------------------------------

def _fused_cnn_kernel(x_ref, w1_ref, b1_ref, s1_ref, w2_ref, b2_ref,
                      s2_ref, wfc_ref, bfc_ref, o_ref):
    # ---- conv1 (3x3, pad 1) in padded-flat coords + bias + ReLU ----
    xv = x_ref[0]                                   # (1, 900)  padded 30x30
    w1 = w1_ref[...]                                # (8, 9)    [co, ky*3+kx]
    acc1 = jnp.zeros((8, _Q1), jnp.float32)
    for t in range(9):
        ky, kx = t // 3, t % 3
        off = ky * _WP1 + kx
        acc1 = acc1 + w1[:, t:t + 1] * xv[:, off:off + _Q1]   # VPU FMA
    o1 = jnp.maximum(acc1 + b1_ref[...], 0.0)       # (8, 838)

    # ---- maxpool 2x2/2 + repack into conv2's zero-padded flat layout ----
    m1 = jnp.maximum(jnp.maximum(o1[:, 0:_M1], o1[:, 1:1 + _M1]),
                     jnp.maximum(o1[:, _WP1:_WP1 + _M1],
                                 o1[:, _WP1 + 1:_WP1 + 1 + _M1]))  # (8, 807)
    in2 = jnp.dot(m1, s1_ref[...],
                  preferred_element_type=jnp.float32)              # (8, 256)

    # ---- conv2 (3x3, pad 1) + bias + ReLU ----
    acc2 = jnp.zeros((16, _Q2), jnp.float32)
    for t in range(9):
        ky, kx = t // 3, t % 3
        off = ky * _WP2 + kx
        acc2 = acc2 + jnp.dot(w2_ref[t], in2[:, off:off + _Q2],
                              preferred_element_type=jnp.float32)  # MXU
    o2 = jnp.maximum(acc2 + b2_ref[...], 0.0)       # (16, 222)

    # ---- maxpool 2x2/2 + flatten-select (per-channel row-major order) ----
    m2 = jnp.maximum(jnp.maximum(o2[:, 0:_M2], o2[:, 1:1 + _M2]),
                     jnp.maximum(o2[:, _WP2:_WP2 + _M2],
                                 o2[:, _WP2 + 1:_WP2 + 1 + _M2]))  # (16, 205)
    p2 = jnp.dot(m2, s2_ref[...],
                 preferred_element_type=jnp.float32)               # (16, 49)

    # ---- fc1: torch CHW flatten order via (16, 49, 10) weight layout ----
    acc = jnp.zeros((1, 10), jnp.float32)
    for c in range(16):
        acc = acc + jnp.dot(p2[c:c + 1, :], wfc_ref[c],
                            preferred_element_type=jnp.float32)
    o_ref[0] = acc + bfc_ref[...]                   # (1, 10)


# ------------------------------ forward wrapper ------------------------------

def init_params(key):
    k1, k2, k3 = jax.random.split(key, 3)
    w1 = jax.random.normal(k1, (3, 3, 1, 8), jnp.float32) * 0.1      # HWIO
    b1 = jnp.linspace(-0.05, 0.05, 8, dtype=jnp.float32)
    w2 = jax.random.normal(k2, (3, 3, 8, 16), jnp.float32) * 0.1     # HWIO
    b2 = jnp.linspace(-0.05, 0.05, 16, dtype=jnp.float32)
    wfc = jax.random.normal(k3, (16 * 7 * 7, 10), jnp.float32) * 0.05
    bfc = jnp.linspace(-0.05, 0.05, 10, dtype=jnp.float32)
    return w1, b1, w2, b2, wfc, bfc


def cnn_forward(x_nchw, params):
    w1, b1, w2, b2, wfc, bfc = params
    B = x_nchw.shape[0]

    # Light, weight/layout-only glue (no activation-sized HBM intermediates).
    xp = jnp.pad(x_nchw[:, 0], ((0, 0), (1, 1), (1, 1)))        # (B, 30, 30)
    xpf = xp.reshape(B, 1, _WP1 * _WP1)                         # (B, 1, 900)
    w1k = w1.reshape(9, 8).T                                    # (8, 9)
    w2t = jnp.transpose(w2.reshape(9, 8, 16), (0, 2, 1))        # (9, 16, 8)
    wfc_r = wfc.reshape(16, 49, 10)                             # CHW order
    s1 = jnp.asarray(_S1)
    s2 = jnp.asarray(_S2)

    out = pl.pallas_call(
        _fused_cnn_kernel,
        out_shape=jax.ShapeDtypeStruct((B, 1, 10), jnp.float32),
        grid=(B,),
        in_specs=[
            pl.BlockSpec((1, 1, _WP1 * _WP1), lambda b: (b, 0, 0)),   # x
            pl.BlockSpec((8, 9), lambda b: (0, 0)),                   # w1
            pl.BlockSpec((8, 1), lambda b: (0, 0)),                   # b1
            pl.BlockSpec((_M1, _WP2 * _WP2), lambda b: (0, 0)),       # S1
            pl.BlockSpec((9, 16, 8), lambda b: (0, 0, 0)),            # w2
            pl.BlockSpec((16, 1), lambda b: (0, 0)),                  # b2
            pl.BlockSpec((_M2, 49), lambda b: (0, 0)),                # S2
            pl.BlockSpec((16, 49, 10), lambda b: (0, 0, 0)),          # wfc
            pl.BlockSpec((1, 10), lambda b: (0, 0)),                  # bfc
        ],
        out_specs=pl.BlockSpec((1, 1, 10), lambda b: (b, 0, 0)),
        compiler_params=pltpu.CompilerParams(
            dimension_semantics=("parallel",),
            vmem_limit_bytes=32 * 1024 * 1024,
        ),
    )(xpf, w1k, b1.reshape(8, 1), s1, w2t, b2.reshape(16, 1), s2,
      wfc_r, bfc.reshape(1, 10))
    return out.reshape(B, 10)


# ----------------------------- pure-JAX reference ----------------------------

def reference_forward(x_nchw, params):
    w1, b1, w2, b2, wfc, bfc = params
    dn = ('NCHW', 'HWIO', 'NCHW')
    h = lax.conv_general_dilated(x_nchw, w1, (1, 1), ((1, 1), (1, 1)),
                                 dimension_numbers=dn)
    h = jnp.maximum(h + b1[None, :, None, None], 0.0)
    h = lax.reduce_window(h, -jnp.inf, lax.max, (1, 1, 2, 2), (1, 1, 2, 2),
                          'VALID')
    h = lax.conv_general_dilated(h, w2, (1, 1), ((1, 1), (1, 1)),
                                 dimension_numbers=dn)
    h = jnp.maximum(h + b2[None, :, None, None], 0.0)
    h = lax.reduce_window(h, -jnp.inf, lax.max, (1, 1, 2, 2), (1, 1, 2, 2),
                          'VALID')
    flat = h.reshape(h.shape[0], -1)
    return flat @ wfc + bfc


if __name__ == "__main__":
    key = jax.random.PRNGKey(0)
    kx, kp = jax.random.split(key)
    # fc1 = Linear(16*7*7, 10) implies 28x28 single-channel inputs
    x = jax.random.normal(kx, (2, 1, 28, 28), jnp.float32)   # NCHW like torch
    params = init_params(kp)

    fwd = jax.jit(cnn_forward)
    out = jax.block_until_ready(fwd(x, params))
    assert out.shape == (2, 10), out.shape

    ref = reference_forward(x, params)
    err = float(jnp.max(jnp.abs(out - ref)))
    assert jnp.allclose(out, ref, atol=2e-3, rtol=2e-3), err
    print("KERNEL_OK")
</pallas_src>

<mosaic_0001>
module attributes {stable_mosaic.version = 11 : i64} {
  func.func @_fused_cnn_kernel(%arg0: i32, %arg1: memref<1x1x900xf32, #tpu.memory_space<vmem>>, %arg2: memref<8x9xf32, #tpu.memory_space<vmem>>, %arg3: memref<8x1xf32, #tpu.memory_space<vmem>>, %arg4: memref<807x256xf32, #tpu.memory_space<vmem>>, %arg5: memref<9x16x8xf32, #tpu.memory_space<vmem>>, %arg6: memref<16x1xf32, #tpu.memory_space<vmem>>, %arg7: memref<205x49xf32, #tpu.memory_space<vmem>>, %arg8: memref<16x49x10xf32, #tpu.memory_space<vmem>>, %arg9: memref<1x10xf32, #tpu.memory_space<vmem>>, %arg10: memref<1x1x10xf32, #tpu.memory_space<vmem>>) attributes {dimension_semantics = [#tpu.dimension_semantics<parallel>], iteration_bounds = array<i64: 2>, scalar_prefetch = 0 : i64, scratch_operands = 0 : i64, tpu.core_type = #tpu.core_type<tc>, window_params = [{transform_indices = @transform_0, window_bounds = array<i64: 1, 1, 900>}, {pipeline_mode = #tpu.pipeline_mode<synchronous>, transform_indices = @transform_1, window_bounds = array<i64: 8, 9>}, {pipeline_mode = #tpu.pipeline_mode<synchronous>, transform_indices = @transform_2, window_bounds = array<i64: 8, 1>}, {pipeline_mode = #tpu.pipeline_mode<synchronous>, transform_indices = @transform_3, window_bounds = array<i64: 807, 256>}, {pipeline_mode = #tpu.pipeline_mode<synchronous>, transform_indices = @transform_4, window_bounds = array<i64: 9, 16, 8>}, {pipeline_mode = #tpu.pipeline_mode<synchronous>, transform_indices = @transform_5, window_bounds = array<i64: 16, 1>}, {pipeline_mode = #tpu.pipeline_mode<synchronous>, transform_indices = @transform_6, window_bounds = array<i64: 205, 49>}, {pipeline_mode = #tpu.pipeline_mode<synchronous>, transform_indices = @transform_7, window_bounds = array<i64: 16, 49, 10>}, {pipeline_mode = #tpu.pipeline_mode<synchronous>, transform_indices = @transform_8, window_bounds = array<i64: 1, 10>}, {transform_indices = @transform_9, window_bounds = array<i64: 1, 1, 10>}]} {
    %c0 = arith.constant 0 : index
    %c0_0 = arith.constant 0 : index
    %c0_1 = arith.constant 0 : index
    %0 = vector.load %arg1[%c0, %c0_0, %c0_1] : memref<1x1x900xf32, #tpu.memory_space<vmem>>, vector<1x1x900xf32>
    %1 = vector.shape_cast %0 : vector<1x1x900xf32> to vector<1x900xf32>
    %c0_2 = arith.constant 0 : index
    %c0_3 = arith.constant 0 : index
    %2 = vector.load %arg2[%c0_2, %c0_3] : memref<8x9xf32, #tpu.memory_space<vmem>>, vector<8x9xf32>
    %cst = arith.constant 0.000000e+00 : f32
    %3 = vector.broadcast %cst : f32 to vector<8x838xf32>
    %4 = vector.extract_strided_slice %2 {offsets = [0, 0], sizes = [8, 1], strides = [1, 1]} : vector<8x9xf32> to vector<8x1xf32>
    %5 = vector.extract_strided_slice %1 {offsets = [0, 0], sizes = [1, 838], strides = [1, 1]} : vector<1x900xf32> to vector<1x838xf32>
    %6 = vector.broadcast %4 : vector<8x1xf32> to vector<8x838xf32>
    %7 = vector.broadcast %5 : vector<1x838xf32> to vector<8x838xf32>
    %8 = arith.mulf %6, %7 : vector<8x838xf32>
    %9 = arith.addf %3, %8 : vector<8x838xf32>
    %10 = vector.extract_strided_slice %2 {offsets = [0, 1], sizes = [8, 1], strides = [1, 1]} : vector<8x9xf32> to vector<8x1xf32>
    %11 = vector.extract_strided_slice %1 {offsets = [0, 1], sizes = [1, 838], strides = [1, 1]} : vector<1x900xf32> to vector<1x838xf32>
    %12 = vector.broadcast %10 : vector<8x1xf32> to vector<8x838xf32>
    %13 = vector.broadcast %11 : vector<1x838xf32> to vector<8x838xf32>
    %14 = arith.mulf %12, %13 : vector<8x838xf32>
    %15 = arith.addf %9, %14 : vector<8x838xf32>
    %16 = vector.extract_strided_slice %2 {offsets = [0, 2], sizes = [8, 1], strides = [1, 1]} : vector<8x9xf32> to vector<8x1xf32>
    %17 = vector.extract_strided_slice %1 {offsets = [0, 2], sizes = [1, 838], strides = [1, 1]} : vector<1x900xf32> to vector<1x838xf32>
    %18 = vector.broadcast %16 : vector<8x1xf32> to vector<8x838xf32>
    %19 = vector.broadcast %17 : vector<1x838xf32> to vector<8x838xf32>
    %20 = arith.mulf %18, %19 : vector<8x838xf32>
    %21 = arith.addf %15, %20 : vector<8x838xf32>
    %22 = vector.extract_strided_slice %2 {offsets = [0, 3], sizes = [8, 1], strides = [1, 1]} : vector<8x9xf32> to vector<8x1xf32>
    %23 = vector.extract_strided_slice %1 {offsets = [0, 30], sizes = [1, 838], strides = [1, 1]} : vector<1x900xf32> to vector<1x838xf32>
    %24 = vector.broadcast %22 : vector<8x1xf32> to vector<8x838xf32>
    %25 = vector.broadcast %23 : vector<1x838xf32> to vector<8x838xf32>
    %26 = arith.mulf %24, %25 : vector<8x838xf32>
    %27 = arith.addf %21, %26 : vector<8x838xf32>
    %28 = vector.extract_strided_slice %2 {offsets = [0, 4], sizes = [8, 1], strides = [1, 1]} : vector<8x9xf32> to vector<8x1xf32>
    %29 = vector.extract_strided_slice %1 {offsets = [0, 31], sizes = [1, 838], strides = [1, 1]} : vector<1x900xf32> to vector<1x838xf32>
    %30 = vector.broadcast %28 : vector<8x1xf32> to vector<8x838xf32>
    %31 = vector.broadcast %29 : vector<1x838xf32> to vector<8x838xf32>
    %32 = arith.mulf %30, %31 : vector<8x838xf32>
    %33 = arith.addf %27, %32 : vector<8x838xf32>
    %34 = vector.extract_strided_slice %2 {offsets = [0, 5], sizes = [8, 1], strides = [1, 1]} : vector<8x9xf32> to vector<8x1xf32>
    %35 = vector.extract_strided_slice %1 {offsets = [0, 32], sizes = [1, 838], strides = [1, 1]} : vector<1x900xf32> to vector<1x838xf32>
    %36 = vector.broadcast %34 : vector<8x1xf32> to vector<8x838xf32>
    %37 = vector.broadcast %35 : vector<1x838xf32> to vector<8x838xf32>
    %38 = arith.mulf %36, %37 : vector<8x838xf32>
    %39 = arith.addf %33, %38 : vector<8x838xf32>
    %40 = vector.extract_strided_slice %2 {offsets = [0, 6], sizes = [8, 1], strides = [1, 1]} : vector<8x9xf32> to vector<8x1xf32>
    %41 = vector.extract_strided_slice %1 {offsets = [0, 60], sizes = [1, 838], strides = [1, 1]} : vector<1x900xf32> to vector<1x838xf32>
    %42 = vector.broadcast %40 : vector<8x1xf32> to vector<8x838xf32>
    %43 = vector.broadcast %41 : vector<1x838xf32> to vector<8x838xf32>
    %44 = arith.mulf %42, %43 : vector<8x838xf32>
    %45 = arith.addf %39, %44 : vector<8x838xf32>
    %46 = vector.extract_strided_slice %2 {offsets = [0, 7], sizes = [8, 1], strides = [1, 1]} : vector<8x9xf32> to vector<8x1xf32>
    %47 = vector.extract_strided_slice %1 {offsets = [0, 61], sizes = [1, 838], strides = [1, 1]} : vector<1x900xf32> to vector<1x838xf32>
    %48 = vector.broadcast %46 : vector<8x1xf32> to vector<8x838xf32>
    %49 = vector.broadcast %47 : vector<1x838xf32> to vector<8x838xf32>
    %50 = arith.mulf %48, %49 : vector<8x838xf32>
    %51 = arith.addf %45, %50 : vector<8x838xf32>
    %52 = vector.extract_strided_slice %2 {offsets = [0, 8], sizes = [8, 1], strides = [1, 1]} : vector<8x9xf32> to vector<8x1xf32>
    %53 = vector.extract_strided_slice %1 {offsets = [0, 62], sizes = [1, 838], strides = [1, 1]} : vector<1x900xf32> to vector<1x838xf32>
    %54 = vector.broadcast %52 : vector<8x1xf32> to vector<8x838xf32>
    %55 = vector.broadcast %53 : vector<1x838xf32> to vector<8x838xf32>
    %56 = arith.mulf %54, %55 : vector<8x838xf32>
    %57 = arith.addf %51, %56 : vector<8x838xf32>
    %c0_4 = arith.constant 0 : index
    %c0_5 = arith.constant 0 : index
    %58 = vector.load %arg3[%c0_4, %c0_5] : memref<8x1xf32, #tpu.memory_space<vmem>>, vector<8x1xf32>
    %59 = vector.broadcast %58 : vector<8x1xf32> to vector<8x838xf32>
    %60 = arith.addf %57, %59 : vector<8x838xf32>
    %cst_6 = arith.constant 0.000000e+00 : f32
    %61 = vector.broadcast %cst_6 : f32 to vector<8x838xf32>
    %62 = arith.maximumf %60, %61 : vector<8x838xf32>
    %63 = vector.extract_strided_slice %62 {offsets = [0, 0], sizes = [8, 807], strides = [1, 1]} : vector<8x838xf32> to vector<8x807xf32>
    %64 = vector.extract_strided_slice %62 {offsets = [0, 1], sizes = [8, 807], strides = [1, 1]} : vector<8x838xf32> to vector<8x807xf32>
    %65 = arith.maximumf %63, %64 : vector<8x807xf32>
    %66 = vector.extract_strided_slice %62 {offsets = [0, 30], sizes = [8, 807], strides = [1, 1]} : vector<8x838xf32> to vector<8x807xf32>
    %67 = vector.extract_strided_slice %62 {offsets = [0, 31], sizes = [8, 807], strides = [1, 1]} : vector<8x838xf32> to vector<8x807xf32>
    %68 = arith.maximumf %66, %67 : vector<8x807xf32>
    %69 = arith.maximumf %65, %68 : vector<8x807xf32>
    %c0_7 = arith.constant 0 : index
    %c0_8 = arith.constant 0 : index
    %70 = vector.load %arg4[%c0_7, %c0_8] : memref<807x256xf32, #tpu.memory_space<vmem>>, vector<807x256xf32>
    %cst_9 = arith.constant dense<0.000000e+00> : vector<8x256xf32>
    %71 = tpu.matmul %69, %70, %cst_9 {dimension_numbers = #tpu.dot_dimension_numbers<[1], [0], [0], [1], [0, 0, 1, 1], [], []>} : vector<8x807xf32>, vector<807x256xf32>, vector<8x256xf32> -> vector<8x256xf32>
    %cst_10 = arith.constant 0.000000e+00 : f32
    %72 = vector.broadcast %cst_10 : f32 to vector<16x222xf32>
    %c0_11 = arith.constant 0 : index
    %c0_12 = arith.constant 0 : index
    %c0_13 = arith.constant 0 : index
    %73 = vector.load %arg5[%c0_11, %c0_12, %c0_13] : memref<9x16x8xf32, #tpu.memory_space<vmem>>, vector<1x16x8xf32>
    %74 = vector.shape_cast %73 : vector<1x16x8xf32> to vector<16x8xf32>
    %75 = vector.extract_strided_slice %71 {offsets = [0, 0], sizes = [8, 222], strides = [1, 1]} : vector<8x256xf32> to vector<8x222xf32>
    %cst_14 = arith.constant dense<0.000000e+00> : vector<16x222xf32>
    %76 = tpu.matmul %74, %75, %cst_14 {dimension_numbers = #tpu.dot_dimension_numbers<[1], [0], [0], [1], [0, 0, 1, 1], [], []>} : vector<16x8xf32>, vector<8x222xf32>, vector<16x222xf32> -> vector<16x222xf32>
    %77 = arith.addf %72, %76 : vector<16x222xf32>
    %c1 = arith.constant 1 : index
    %c0_15 = arith.constant 0 : index
    %c0_16 = arith.constant 0 : index
    %78 = vector.load %arg5[%c1, %c0_15, %c0_16] : memref<9x16x8xf32, #tpu.memory_space<vmem>>, vector<1x16x8xf32>
    %79 = vector.shape_cast %78 : vector<1x16x8xf32> to vector<16x8xf32>
    %80 = vector.extract_strided_slice %71 {offsets = [0, 1], sizes = [8, 222], strides = [1, 1]} : vector<8x256xf32> to vector<8x222xf32>
    %cst_17 = arith.constant dense<0.000000e+00> : vector<16x222xf32>
    %81 = tpu.matmul %79, %80, %cst_17 {dimension_numbers = #tpu.dot_dimension_numbers<[1], [0], [0], [1], [0, 0, 1, 1], [], []>} : vector<16x8xf32>, vector<8x222xf32>, vector<16x222xf32> -> vector<16x222xf32>
    %82 = arith.addf %77, %81 : vector<16x222xf32>
    %c2 = arith.constant 2 : index
    %c0_18 = arith.constant 0 : index
    %c0_19 = arith.constant 0 : index
    %83 = vector.load %arg5[%c2, %c0_18, %c0_19] : memref<9x16x8xf32, #tpu.memory_space<vmem>>, vector<1x16x8xf32>
    %84 = vector.shape_cast %83 : vector<1x16x8xf32> to vector<16x8xf32>
    %85 = vector.extract_strided_slice %71 {offsets = [0, 2], sizes = [8, 222], strides = [1, 1]} : vector<8x256xf32> to vector<8x222xf32>
    %cst_20 = arith.constant dense<0.000000e+00> : vector<16x222xf32>
    %86 = tpu.matmul %84, %85, %cst_20 {dimension_numbers = #tpu.dot_dimension_numbers<[1], [0], [0], [1], [0, 0, 1, 1], [], []>} : vector<16x8xf32>, vector<8x222xf32>, vector<16x222xf32> -> vector<16x222xf32>
    %87 = arith.addf %82, %86 : vector<16x222xf32>
    %c3 = arith.constant 3 : index
    %c0_21 = arith.constant 0 : index
    %c0_22 = arith.constant 0 : index
    %88 = vector.load %arg5[%c3, %c0_21, %c0_22] : memref<9x16x8xf32, #tpu.memory_space<vmem>>, vector<1x16x8xf32>
    %89 = vector.shape_cast %88 : vector<1x16x8xf32> to vector<16x8xf32>
    %90 = vector.extract_strided_slice %71 {offsets = [0, 16], sizes = [8, 222], strides = [1, 1]} : vector<8x256xf32> to vector<8x222xf32>
    %cst_23 = arith.constant dense<0.000000e+00> : vector<16x222xf32>
    %91 = tpu.matmul %89, %90, %cst_23 {dimension_numbers = #tpu.dot_dimension_numbers<[1], [0], [0], [1], [0, 0, 1, 1], [], []>} : vector<16x8xf32>, vector<8x222xf32>, vector<16x222xf32> -> vector<16x222xf32>
    %92 = arith.addf %87, %91 : vector<16x222xf32>
    %c4 = arith.constant 4 : index
    %c0_24 = arith.constant 0 : index
    %c0_25 = arith.constant 0 : index
    %93 = vector.load %arg5[%c4, %c0_24, %c0_25] : memref<9x16x8xf32, #tpu.memory_space<vmem>>, vector<1x16x8xf32>
    %94 = vector.shape_cast %93 : vector<1x16x8xf32> to vector<16x8xf32>
    %95 = vector.extract_strided_slice %71 {offsets = [0, 17], sizes = [8, 222], strides = [1, 1]} : vector<8x256xf32> to vector<8x222xf32>
    %cst_26 = arith.constant dense<0.000000e+00> : vector<16x222xf32>
    %96 = tpu.matmul %94, %95, %cst_26 {dimension_numbers = #tpu.dot_dimension_numbers<[1], [0], [0], [1], [0, 0, 1, 1], [], []>} : vector<16x8xf32>, vector<8x222xf32>, vector<16x222xf32> -> vector<16x222xf32>
    %97 = arith.addf %92, %96 : vector<16x222xf32>
    %c5 = arith.constant 5 : index
    %c0_27 = arith.constant 0 : index
    %c0_28 = arith.constant 0 : index
    %98 = vector.load %arg5[%c5, %c0_27, %c0_28] : memref<9x16x8xf32, #tpu.memory_space<vmem>>, vector<1x16x8xf32>
    %99 = vector.shape_cast %98 : vector<1x16x8xf32> to vector<16x8xf32>
    %100 = vector.extract_strided_slice %71 {offsets = [0, 18], sizes = [8, 222], strides = [1, 1]} : vector<8x256xf32> to vector<8x222xf32>
    %cst_29 = arith.constant dense<0.000000e+00> : vector<16x222xf32>
    %101 = tpu.matmul %99, %100, %cst_29 {dimension_numbers = #tpu.dot_dimension_numbers<[1], [0], [0], [1], [0, 0, 1, 1], [], []>} : vector<16x8xf32>, vector<8x222xf32>, vector<16x222xf32> -> vector<16x222xf32>
    %102 = arith.addf %97, %101 : vector<16x222xf32>
    %c6 = arith.constant 6 : index
    %c0_30 = arith.constant 0 : index
    %c0_31 = arith.constant 0 : index
    %103 = vector.load %arg5[%c6, %c0_30, %c0_31] : memref<9x16x8xf32, #tpu.memory_space<vmem>>, vector<1x16x8xf32>
    %104 = vector.shape_cast %103 : vector<1x16x8xf32> to vector<16x8xf32>
    %105 = vector.extract_strided_slice %71 {offsets = [0, 32], sizes = [8, 222], strides = [1, 1]} : vector<8x256xf32> to vector<8x222xf32>
    %cst_32 = arith.constant dense<0.000000e+00> : vector<16x222xf32>
    %106 = tpu.matmul %104, %105, %cst_32 {dimension_numbers = #tpu.dot_dimension_numbers<[1], [0], [0], [1], [0, 0, 1, 1], [], []>} : vector<16x8xf32>, vector<8x222xf32>, vector<16x222xf32> -> vector<16x222xf32>
    %107 = arith.addf %102, %106 : vector<16x222xf32>
    %c7 = arith.constant 7 : index
    %c0_33 = arith.constant 0 : index
    %c0_34 = arith.constant 0 : index
    %108 = vector.load %arg5[%c7, %c0_33, %c0_34] : memref<9x16x8xf32, #tpu.memory_space<vmem>>, vector<1x16x8xf32>
    %109 = vector.shape_cast %108 : vector<1x16x8xf32> to vector<16x8xf32>
    %110 = vector.extract_strided_slice %71 {offsets = [0, 33], sizes = [8, 222], strides = [1, 1]} : vector<8x256xf32> to vector<8x222xf32>
    %cst_35 = arith.constant dense<0.000000e+00> : vector<16x222xf32>
    %111 = tpu.matmul %109, %110, %cst_35 {dimension_numbers = #tpu.dot_dimension_numbers<[1], [0], [0], [1], [0, 0, 1, 1], [], []>} : vector<16x8xf32>, vector<8x222xf32>, vector<16x222xf32> -> vector<16x222xf32>
    %112 = arith.addf %107, %111 : vector<16x222xf32>
    %c8 = arith.constant 8 : index
    %c0_36 = arith.constant 0 : index
    %c0_37 = arith.constant 0 : index
    %113 = vector.load %arg5[%c8, %c0_36, %c0_37] : memref<9x16x8xf32, #tpu.memory_space<vmem>>, vector<1x16x8xf32>
    %114 = vector.shape_cast %113 : vector<1x16x8xf32> to vector<16x8xf32>
    %115 = vector.extract_strided_slice %71 {offsets = [0, 34], sizes = [8, 222], strides = [1, 1]} : vector<8x256xf32> to vector<8x222xf32>
    %cst_38 = arith.constant dense<0.000000e+00> : vector<16x222xf32>
    %116 = tpu.matmul %114, %115, %cst_38 {dimension_numbers = #tpu.dot_dimension_numbers<[1], [0], [0], [1], [0, 0, 1, 1], [], []>} : vector<16x8xf32>, vector<8x222xf32>, vector<16x222xf32> -> vector<16x222xf32>
    %117 = arith.addf %112, %116 : vector<16x222xf32>
    %c0_39 = arith.constant 0 : index
    %c0_40 = arith.constant 0 : index
    %118 = vector.load %arg6[%c0_39, %c0_40] : memref<16x1xf32, #tpu.memory_space<vmem>>, vector<16x1xf32>
    %119 = vector.broadcast %118 : vector<16x1xf32> to vector<16x222xf32>
    %120 = arith.addf %117, %119 : vector<16x222xf32>
    %cst_41 = arith.constant 0.000000e+00 : f32
    %121 = vector.broadcast %cst_41 : f32 to vector<16x222xf32>
    %122 = arith.maximumf %120, %121 : vector<16x222xf32>
    %123 = vector.extract_strided_slice %122 {offsets = [0, 0], sizes = [16, 205], strides = [1, 1]} : vector<16x222xf32> to vector<16x205xf32>
    %124 = vector.extract_strided_slice %122 {offsets = [0, 1], sizes = [16, 205], strides = [1, 1]} : vector<16x222xf32> to vector<16x205xf32>
    %125 = arith.maximumf %123, %124 : vector<16x205xf32>
    %126 = vector.extract_strided_slice %122 {offsets = [0, 16], sizes = [16, 205], strides = [1, 1]} : vector<16x222xf32> to vector<16x205xf32>
    %127 = vector.extract_strided_slice %122 {offsets = [0, 17], sizes = [16, 205], strides = [1, 1]} : vector<16x222xf32> to vector<16x205xf32>
    %128 = arith.maximumf %126, %127 : vector<16x205xf32>
    %129 = arith.maximumf %125, %128 : vector<16x205xf32>
    %c0_42 = arith.constant 0 : index
    %c0_43 = arith.constant 0 : index
    %130 = vector.load %arg7[%c0_42, %c0_43] : memref<205x49xf32, #tpu.memory_space<vmem>>, vector<205x49xf32>
    %cst_44 = arith.constant dense<0.000000e+00> : vector<16x49xf32>
    %131 = tpu.matmul %129, %130, %cst_44 {dimension_numbers = #tpu.dot_dimension_numbers<[1], [0], [0], [1], [0, 0, 1, 1], [], []>} : vector<16x205xf32>, vector<205x49xf32>, vector<16x49xf32> -> vector<16x49xf32>
    %cst_45 = arith.constant 0.000000e+00 : f32
    %132 = vector.broadcast %cst_45 : f32 to vector<1x10xf32>
    %133 = vector.extract_strided_slice %131 {offsets = [0, 0], sizes = [1, 49], strides = [1, 1]} : vector<16x49xf32> to vector<1x49xf32>
    %c0_46 = arith.constant 0 : index
    %c0_47 = arith.constant 0 : index
    %c0_48 = arith.constant 0 : index
    %134 = vector.load %arg8[%c0_46, %c0_47, %c0_48] : memref<16x49x10xf32, #tpu.memory_space<vmem>>, vector<1x49x10xf32>
    %135 = vector.shape_cast %134 : vector<1x49x10xf32> to vector<49x10xf32>
    %cst_49 = arith.constant dense<0.000000e+00> : vector<1x10xf32>
    %136 = tpu.matmul %133, %135, %cst_49 {dimension_numbers = #tpu.dot_dimension_numbers<[1], [0], [0], [1], [0, 0, 1, 1], [], []>} : vector<1x49xf32>, vector<49x10xf32>, vector<1x10xf32> -> vector<1x10xf32>
    %137 = arith.addf %132, %136 : vector<1x10xf32>
    %138 = vector.extract_strided_slice %131 {offsets = [1, 0], sizes = [1, 49], strides = [1, 1]} : vector<16x49xf32> to vector<1x49xf32>
    %c1_50 = arith.constant 1 : index
    %c0_51 = arith.constant 0 : index
    %c0_52 = arith.constant 0 : index
    %139 = vector.load %arg8[%c1_50, %c0_51, %c0_52] : memref<16x49x10xf32, #tpu.memory_space<vmem>>, vector<1x49x10xf32>
    %140 = vector.shape_cast %139 : vector<1x49x10xf32> to vector<49x10xf32>
    %cst_53 = arith.constant dense<0.000000e+00> : vector<1x10xf32>
    %141 = tpu.matmul %138, %140, %cst_53 {dimension_numbers = #tpu.dot_dimension_numbers<[1], [0], [0], [1], [0, 0, 1, 1], [], []>} : vector<1x49xf32>, vector<49x10xf32>, vector<1x10xf32> -> vector<1x10xf32>
    %142 = arith.addf %137, %141 : vector<1x10xf32>
    %143 = vector.extract_strided_slice %131 {offsets = [2, 0], sizes = [1, 49], strides = [1, 1]} : vector<16x49xf32> to vector<1x49xf32>
    %c2_54 = arith.constant 2 : index
    %c0_55 = arith.constant 0 : index
    %c0_56 = arith.constant 0 : index
    %144 = vector.load %arg8[%c2_54, %c0_55, %c0_56] : memref<16x49x10xf32, #tpu.memory_space<vmem>>, vector<1x49x10xf32>
    %145 = vector.shape_cast %144 : vector<1x49x10xf32> to vector<49x10xf32>
    %cst_57 = arith.constant dense<0.000000e+00> : vector<1x10xf32>
    %146 = tpu.matmul %143, %145, %cst_57 {dimension_numbers = #tpu.dot_dimension_numbers<[1], [0], [0], [1], [0, 0, 1, 1], [], []>} : vector<1x49xf32>, vector<49x10xf32>, vector<1x10xf32> -> vector<1x10xf32>
    %147 = arith.addf %142, %146 : vector<1x10xf32>
    %148 = vector.extract_strided_slice %131 {offsets = [3, 0], sizes = [1, 49], strides = [1, 1]} : vector<16x49xf32> to vector<1x49xf32>
    %c3_58 = arith.constant 3 : index
    %c0_59 = arith.constant 0 : index
    %c0_60 = arith.constant 0 : index
    %149 = vector.load %arg8[%c3_58, %c0_59, %c0_60] : memref<16x49x10xf32, #tpu.memory_space<vmem>>, vector<1x49x10xf32>
    %150 = vector.shape_cast %149 : vector<1x49x10xf32> to vector<49x10xf32>
    %cst_61 = arith.constant dense<0.000000e+00> : vector<1x10xf32>
    %151 = tpu.matmul %148, %150, %cst_61 {dimension_numbers = #tpu.dot_dimension_numbers<[1], [0], [0], [1], [0, 0, 1, 1], [], []>} : vector<1x49xf32>, vector<49x10xf32>, vector<1x10xf32> -> vector<1x10xf32>
    %152 = arith.addf %147, %151 : vector<1x10xf32>
    %153 = vector.extract_strided_slice %131 {offsets = [4, 0], sizes = [1, 49], strides = [1, 1]} : vector<16x49xf32> to vector<1x49xf32>
    %c4_62 = arith.constant 4 : index
    %c0_63 = arith.constant 0 : index
    %c0_64 = arith.constant 0 : index
    %154 = vector.load %arg8[%c4_62, %c0_63, %c0_64] : memref<16x49x10xf32, #tpu.memory_space<vmem>>, vector<1x49x10xf32>
    %155 = vector.shape_cast %154 : vector<1x49x10xf32> to vector<49x10xf32>
    %cst_65 = arith.constant dense<0.000000e+00> : vector<1x10xf32>
    %156 = tpu.matmul %153, %155, %cst_65 {dimension_numbers = #tpu.dot_dimension_numbers<[1], [0], [0], [1], [0, 0, 1, 1], [], []>} : vector<1x49xf32>, vector<49x10xf32>, vector<1x10xf32> -> vector<1x10xf32>
    %157 = arith.addf %152, %156 : vector<1x10xf32>
    %158 = vector.extract_strided_slice %131 {offsets = [5, 0], sizes = [1, 49], strides = [1, 1]} : vector<16x49xf32> to vector<1x49xf32>
    %c5_66 = arith.constant 5 : index
    %c0_67 = arith.constant 0 : index
    %c0_68 = arith.constant 0 : index
    %159 = vector.load %arg8[%c5_66, %c0_67, %c0_68] : memref<16x49x10xf32, #tpu.memory_space<vmem>>, vector<1x49x10xf32>
    %160 = vector.shape_cast %159 : vector<1x49x10xf32> to vector<49x10xf32>
    %cst_69 = arith.constant dense<0.000000e+00> : vector<1x10xf32>
    %161 = tpu.matmul %158, %160, %cst_69 {dimension_numbers = #tpu.dot_dimension_numbers<[1], [0], [0], [1], [0, 0, 1, 1], [], []>} : vector<1x49xf32>, vector<49x10xf32>, vector<1x10xf32> -> vector<1x10xf32>
    %162 = arith.addf %157, %161 : vector<1x10xf32>
    %163 = vector.extract_strided_slice %131 {offsets = [6, 0], sizes = [1, 49], strides = [1, 1]} : vector<16x49xf32> to vector<1x49xf32>
    %c6_70 = arith.constant 6 : index
    %c0_71 = arith.constant 0 : index
    %c0_72 = arith.constant 0 : index
    %164 = vector.load %arg8[%c6_70, %c0_71, %c0_72] : memref<16x49x10xf32, #tpu.memory_space<vmem>>, vector<1x49x10xf32>
    %165 = vector.shape_cast %164 : vector<1x49x10xf32> to vector<49x10xf32>
    %cst_73 = arith.constant dense<0.000000e+00> : vector<1x10xf32>
    %166 = tpu.matmul %163, %165, %cst_73 {dimension_numbers = #tpu.dot_dimension_numbers<[1], [0], [0], [1], [0, 0, 1, 1], [], []>} : vector<1x49xf32>, vector<49x10xf32>, vector<1x10xf32> -> vector<1x10xf32>
    %167 = arith.addf %162, %166 : vector<1x10xf32>
    %168 = vector.extract_strided_slice %131 {offsets = [7, 0], sizes = [1, 49], strides = [1, 1]} : vector<16x49xf32> to vector<1x49xf32>
    %c7_74 = arith.constant 7 : index
    %c0_75 = arith.constant 0 : index
    %c0_76 = arith.constant 0 : index
    %169 = vector.load %arg8[%c7_74, %c0_75, %c0_76] : memref<16x49x10xf32, #tpu.memory_space<vmem>>, vector<1x49x10xf32>
    %170 = vector.shape_cast %169 : vector<1x49x10xf32> to vector<49x10xf32>
    %cst_77 = arith.constant dense<0.000000e+00> : vector<1x10xf32>
    %171 = tpu.matmul %168, %170, %cst_77 {dimension_numbers = #tpu.dot_dimension_numbers<[1], [0], [0], [1], [0, 0, 1, 1], [], []>} : vector<1x49xf32>, vector<49x10xf32>, vector<1x10xf32> -> vector<1x10xf32>
    %172 = arith.addf %167, %171 : vector<1x10xf32>
    %173 = vector.extract_strided_slice %131 {offsets = [8, 0], sizes = [1, 49], strides = [1, 1]} : vector<16x49xf32> to vector<1x49xf32>
    %c8_78 = arith.constant 8 : index
    %c0_79 = arith.constant 0 : index
    %c0_80 = arith.constant 0 : index
    %174 = vector.load %arg8[%c8_78, %c0_79, %c0_80] : memref<16x49x10xf32, #tpu.memory_space<vmem>>, vector<1x49x10xf32>
    %175 = vector.shape_cast %174 : vector<1x49x10xf32> to vector<49x10xf32>
    %cst_81 = arith.constant dense<0.000000e+00> : vector<1x10xf32>
    %176 = tpu.matmul %173, %175, %cst_81 {dimension_numbers = #tpu.dot_dimension_numbers<[1], [0], [0], [1], [0, 0, 1, 1], [], []>} : vector<1x49xf32>, vector<49x10xf32>, vector<1x10xf32> -> vector<1x10xf32>
    %177 = arith.addf %172, %176 : vector<1x10xf32>
    %178 = vector.extract_strided_slice %131 {offsets = [9, 0], sizes = [1, 49], strides = [1, 1]} : vector<16x49xf32> to vector<1x49xf32>
    %c9 = arith.constant 9 : index
    %c0_82 = arith.constant 0 : index
    %c0_83 = arith.constant 0 : index
    %179 = vector.load %arg8[%c9, %c0_82, %c0_83] : memref<16x49x10xf32, #tpu.memory_space<vmem>>, vector<1x49x10xf32>
    %180 = vector.shape_cast %179 : vector<1x49x10xf32> to vector<49x10xf32>
    %cst_84 = arith.constant dense<0.000000e+00> : vector<1x10xf32>
    %181 = tpu.matmul %178, %180, %cst_84 {dimension_numbers = #tpu.dot_dimension_numbers<[1], [0], [0], [1], [0, 0, 1, 1], [], []>} : vector<1x49xf32>, vector<49x10xf32>, vector<1x10xf32> -> vector<1x10xf32>
    %182 = arith.addf %177, %181 : vector<1x10xf32>
    %183 = vector.extract_strided_slice %131 {offsets = [10, 0], sizes = [1, 49], strides = [1, 1]} : vector<16x49xf32> to vector<1x49xf32>
    %c10 = arith.constant 10 : index
    %c0_85 = arith.constant 0 : index
    %c0_86 = arith.constant 0 : index
    %184 = vector.load %arg8[%c10, %c0_85, %c0_86] : memref<16x49x10xf32, #tpu.memory_space<vmem>>, vector<1x49x10xf32>
    %185 = vector.shape_cast %184 : vector<1x49x10xf32> to vector<49x10xf32>
    %cst_87 = arith.constant dense<0.000000e+00> : vector<1x10xf32>
    %186 = tpu.matmul %183, %185, %cst_87 {dimension_numbers = #tpu.dot_dimension_numbers<[1], [0], [0], [1], [0, 0, 1, 1], [], []>} : vector<1x49xf32>, vector<49x10xf32>, vector<1x10xf32> -> vector<1x10xf32>
    %187 = arith.addf %182, %186 : vector<1x10xf32>
    %188 = vector.extract_strided_slice %131 {offsets = [11, 0], sizes = [1, 49], strides = [1, 1]} : vector<16x49xf32> to vector<1x49xf32>
    %c11 = arith.constant 11 : index
    %c0_88 = arith.constant 0 : index
    %c0_89 = arith.constant 0 : index
    %189 = vector.load %arg8[%c11, %c0_88, %c0_89] : memref<16x49x10xf32, #tpu.memory_space<vmem>>, vector<1x49x10xf32>
    %190 = vector.shape_cast %189 : vector<1x49x10xf32> to vector<49x10xf32>
    %cst_90 = arith.constant dense<0.000000e+00> : vector<1x10xf32>
    %191 = tpu.matmul %188, %190, %cst_90 {dimension_numbers = #tpu.dot_dimension_numbers<[1], [0], [0], [1], [0, 0, 1, 1], [], []>} : vector<1x49xf32>, vector<49x10xf32>, vector<1x10xf32> -> vector<1x10xf32>
    %192 = arith.addf %187, %191 : vector<1x10xf32>
    %193 = vector.extract_strided_slice %131 {offsets = [12, 0], sizes = [1, 49], strides = [1, 1]} : vector<16x49xf32> to vector<1x49xf32>
    %c12 = arith.constant 12 : index
    %c0_91 = arith.constant 0 : index
    %c0_92 = arith.constant 0 : index
    %194 = vector.load %arg8[%c12, %c0_91, %c0_92] : memref<16x49x10xf32, #tpu.memory_space<vmem>>, vector<1x49x10xf32>
    %195 = vector.shape_cast %194 : vector<1x49x10xf32> to vector<49x10xf32>
    %cst_93 = arith.constant dense<0.000000e+00> : vector<1x10xf32>
    %196 = tpu.matmul %193, %195, %cst_93 {dimension_numbers = #tpu.dot_dimension_numbers<[1], [0], [0], [1], [0, 0, 1, 1], [], []>} : vector<1x49xf32>, vector<49x10xf32>, vector<1x10xf32> -> vector<1x10xf32>
    %197 = arith.addf %192, %196 : vector<1x10xf32>
    %198 = vector.extract_strided_slice %131 {offsets = [13, 0], sizes = [1, 49], strides = [1, 1]} : vector<16x49xf32> to vector<1x49xf32>
    %c13 = arith.constant 13 : index
    %c0_94 = arith.constant 0 : index
    %c0_95 = arith.constant 0 : index
    %199 = vector.load %arg8[%c13, %c0_94, %c0_95] : memref<16x49x10xf32, #tpu.memory_space<vmem>>, vector<1x49x10xf32>
    %200 = vector.shape_cast %199 : vector<1x49x10xf32> to vector<49x10xf32>
    %cst_96 = arith.constant dense<0.000000e+00> : vector<1x10xf32>
    %201 = tpu.matmul %198, %200, %cst_96 {dimension_numbers = #tpu.dot_dimension_numbers<[1], [0], [0], [1], [0, 0, 1, 1], [], []>} : vector<1x49xf32>, vector<49x10xf32>, vector<1x10xf32> -> vector<1x10xf32>
    %202 = arith.addf %197, %201 : vector<1x10xf32>
    %203 = vector.extract_strided_slice %131 {offsets = [14, 0], sizes = [1, 49], strides = [1, 1]} : vector<16x49xf32> to vector<1x49xf32>
    %c14 = arith.constant 14 : index
    %c0_97 = arith.constant 0 : index
    %c0_98 = arith.constant 0 : index
    %204 = vector.load %arg8[%c14, %c0_97, %c0_98] : memref<16x49x10xf32, #tpu.memory_space<vmem>>, vector<1x49x10xf32>
    %205 = vector.shape_cast %204 : vector<1x49x10xf32> to vector<49x10xf32>
    %cst_99 = arith.constant dense<0.000000e+00> : vector<1x10xf32>
    %206 = tpu.matmul %203, %205, %cst_99 {dimension_numbers = #tpu.dot_dimension_numbers<[1], [0], [0], [1], [0, 0, 1, 1], [], []>} : vector<1x49xf32>, vector<49x10xf32>, vector<1x10xf32> -> vector<1x10xf32>
    %207 = arith.addf %202, %206 : vector<1x10xf32>
    %208 = vector.extract_strided_slice %131 {offsets = [15, 0], sizes = [1, 49], strides = [1, 1]} : vector<16x49xf32> to vector<1x49xf32>
    %c15 = arith.constant 15 : index
    %c0_100 = arith.constant 0 : index
    %c0_101 = arith.constant 0 : index
    %209 = vector.load %arg8[%c15, %c0_100, %c0_101] : memref<16x49x10xf32, #tpu.memory_space<vmem>>, vector<1x49x10xf32>
    %210 = vector.shape_cast %209 : vector<1x49x10xf32> to vector<49x10xf32>
    %cst_102 = arith.constant dense<0.000000e+00> : vector<1x10xf32>
    %211 = tpu.matmul %208, %210, %cst_102 {dimension_numbers = #tpu.dot_dimension_numbers<[1], [0], [0], [1], [0, 0, 1, 1], [], []>} : vector<1x49xf32>, vector<49x10xf32>, vector<1x10xf32> -> vector<1x10xf32>
    %212 = arith.addf %207, %211 : vector<1x10xf32>
    %c0_103 = arith.constant 0 : index
    %c0_104 = arith.constant 0 : index
    %213 = vector.load %arg9[%c0_103, %c0_104] : memref<1x10xf32, #tpu.memory_space<vmem>>, vector<1x10xf32>
    %214 = arith.addf %212, %213 : vector<1x10xf32>
    %c0_105 = arith.constant 0 : index
    %c0_106 = arith.constant 0 : index
    %c0_107 = arith.constant 0 : index
    %215 = vector.load %arg10[%c0_105, %c0_106, %c0_107] : memref<1x1x10xf32, #tpu.memory_space<vmem>>, vector<1x1x10xf32>
    %216 = vector.shape_cast %215 : vector<1x1x10xf32> to vector<1x10xf32>
    %217 = vector.shape_cast %214 : vector<1x10xf32> to vector<1x1x10xf32>
    tpu.vector_store %arg10[%c0_105, %c0_106, %c0_107], %217 {strides = array<i32>} : memref<1x1x10xf32, #tpu.memory_space<vmem>>, vector<1x1x10xf32>,
    return
  }
  func.func @transform_0(%arg0: i32) -> (i32, i32, i32) {
    %c0_i32 = arith.constant 0 : i32
    %c0_i32_0 = arith.constant 0 : i32
    %c0_i32_1 = arith.constant 0 : i32
    return %arg0, %c0_i32, %c0_i32_0 : i32, i32, i32
  }
  func.func @transform_1(%arg0: i32) -> (i32, i32) {
    %c0_i32 = arith.constant 0 : i32
    %c0_i32_0 = arith.constant 0 : i32
    %c0_i32_1 = arith.constant 0 : i32
    return %c0_i32, %c0_i32_0 : i32, i32
  }
  func.func @transform_2(%arg0: i32) -> (i32, i32) {
    %c0_i32 = arith.constant 0 : i32
    %c0_i32_0 = arith.constant 0 : i32
    %c0_i32_1 = arith.constant 0 : i32
    return %c0_i32, %c0_i32_0 : i32, i32
  }
  func.func @transform_3(%arg0: i32) -> (i32, i32) {
    %c0_i32 = arith.constant 0 : i32
    %c0_i32_0 = arith.constant 0 : i32
    %c0_i32_1 = arith.constant 0 : i32
    return %c0_i32, %c0_i32_0 : i32, i32
  }
  func.func @transform_4(%arg0: i32) -> (i32, i32, i32) {
    %c0_i32 = arith.constant 0 : i32
    %c0_i32_0 = arith.constant 0 : i32
    %c0_i32_1 = arith.constant 0 : i32
    %c0_i32_2 = arith.constant 0 : i32
    return %c0_i32, %c0_i32_0, %c0_i32_1 : i32, i32, i32
  }
  func.func @transform_5(%arg0: i32) -> (i32, i32) {
    %c0_i32 = arith.constant 0 : i32
    %c0_i32_0 = arith.constant 0 : i32
    %c0_i32_1 = arith.constant 0 : i32
    return %c0_i32, %c0_i32_0 : i32, i32
  }
  func.func @transform_6(%arg0: i32) -> (i32, i32) {
    %c0_i32 = arith.constant 0 : i32
    %c0_i32_0 = arith.constant 0 : i32
    %c0_i32_1 = arith.constant 0 : i32
    return %c0_i32, %c0_i32_0 : i32, i32
  }
  func.func @transform_7(%arg0: i32) -> (i32, i32, i32) {
    %c0_i32 = arith.constant 0 : i32
    %c0_i32_0 = arith.constant 0 : i32
    %c0_i32_1 = arith.constant 0 : i32
    %c0_i32_2 = arith.constant 0 : i32
    return %c0_i32, %c0_i32_0, %c0_i32_1 : i32, i32, i32
  }
  func.func @transform_8(%arg0: i32) -> (i32, i32) {
    %c0_i32 = arith.constant 0 : i32
    %c0_i32_0 = arith.constant 0 : i32
    %c0_i32_1 = arith.constant 0 : i32
    return %c0_i32, %c0_i32_0 : i32, i32
  }
  func.func @transform_9(%arg0: i32) -> (i32, i32, i32) {
    %c0_i32 = arith.constant 0 : i32
    %c0_i32_0 = arith.constant 0 : i32
    %c0_i32_1 = arith.constant 0 : i32
    return %arg0, %c0_i32, %c0_i32_0 : i32, i32, i32
  }
}

</mosaic_0001>

<bundles_post_ra>
// kernel: cnn_forward.1
= control target key start
LH: loop header
LB: loop body
LE: loop exit
PB: predicated region body
PF: predicated region fallthrough
CT: control target
= control target key end

     0   :  { %14 = vsyncpa [#allocation3], 0  ;;  %s4440_s0 = inlined_call_operand.vmem [shape: f32[2,1,900], index: 0, kind: input, shape index: {}]   ;;  %s4441_s1 = inlined_call_operand.vmem [shape: f32[8,9], index: 1, kind: input, shape index: {}]   ;;  %s4442_s2 = inlined_call_operand.vmem [shape: f32[8,1], index: 2, kind: input, shape index: {}]   ;;  %s4443_s3 = inlined_call_operand.hbm [shape: f32[807,256], index: 3, kind: input, shape index: {}]   ;;  %s4444_s4 = inlined_call_operand.vmem [shape: f32[9,16,8], index: 4, kind: input, shape index: {}]   ;;  %s4445_s5 = inlined_call_operand.vmem [shape: f32[16,1], index: 5, kind: input, shape index: {}]   ;;  %s4446_s6 = inlined_call_operand.vmem [shape: f32[205,49], index: 6, kind: input, shape index: {}]   ;;  %s4447_s7 = inlined_call_operand.vmem [shape: f32[16,49,10], index: 7, kind: input, shape index: {}]   ;;  %s4448_s8 = inlined_call_operand.vmem [shape: f32[1,10], index: 8, kind: input, shape index: {}]   ;;  %s4449_s9 = inlined_call_operand.hbm [shape: f32[2,1,10], index: 9, kind: output, shape index: {}]  }
   0x1   :  { %15 = vsyncpa [#allocation4], 0 }
   0x2   :  { %17 = vsyncpa [#allocation4 + $0x1], 0  ;;  %s3285_s30 = smov 0   ;;  %s3287_s10 = smov 0  }
   0x3   :  { %s3289_s11 = smov 0   ;;  %s3291_s12 = smov 0  }
   0x4 LB: > { %s3306_s13 = sadd.s32 4294967295, %s3208_s12   ;;  %s2792_s14 = sadd.s32 4294967294, %s3208_s12   ;;  %s3208_s12 = sphi %s3291_s12, %s4458_s12   ;;  %s3204_s11 = sphi %s3289_s11, %s4457_s11   ;;  %s3200_s10 = sphi %s3287_s10, %s4456_s10   ;;  %s3196_s30 = sphi %s3285_s30, %s4455_s30  }
   0x5   : > { %s3310_s15 = sadd.s32 1, %s3208_s12   ;;  %s224_s16 = sadd.s32 1, %s3204_s11 }
   0x6   : > { %s221_s17 = ssub.s32 %s3208_s12, %s3310_s15  ;;  %p234_p0 = scmp.ne.s32.totalorder %s3204_s11, %s3200_s10 }
   0x7   : > { %p222_p1 = scmp.eq.s32.totalorder %s221_s17, 0  ;;  %p235_p2 = scmp.eq.s32.totalorder %s3306_s13, 1 }
   0x8   : > { %p240_p3 = scmp.ne.s32.totalorder %s3200_s10, %s3196_s30  ;;  %p241_p4 = scmp.eq.s32.totalorder %s2792_s14, 1 }
   0x9   : > { %s3321_s18 = scalar_select %p222_p1, %s3204_s11, %s224_s16  }
   0xa   : > { %p3323_p5 = por %p235_p2, %p234_p0  ;;  %p3327_p6 = por %p241_p4, %p240_p3 }
   0xb   : > { %p2793_p7 = scmp.ge.s32.totalorder %s3208_s12, 1  ;;  %p248_p8 = scmp.lt.s32.totalorder %s3208_s12, 3 }
   0xc   : > { %p3012_p9 = scmp.eq.s32.totalorder %s3306_s13, 0  ;;  %s265_s23 = sshll.u32 %s4443_s3, 4  ;;  %s266_s23 = int_to_ptr.hbm [resolvable:$true] %s265_s23 }
   0xd   : > { %p249_p10 = pnand %p2793_p7, %p248_p8  ;;  %s3210_s24 = smov [#allocation2]  }
   0xe   : > { %s267_s25 = sshll.u32 %s3210_s24, 4  ;;  %s3211_s26 = smov 256   ;;  %s268_s25 = int_to_ptr.vmem [resolvable:$true] %s267_s25 }
   0xf   : > { %p3004_p11 = pneg %p249_p10  ;;  %s3212_s27 = smov 16  }
  0x10   : > { %305 = sbr.rel (%p249_p10) target bundleno = 1707 (0x6ab), region = 56 }
  0x11   : > { %p3005_p12 = pnand %p3012_p9, %p3004_p11 }
  0x13   : > { %3007 = dma.hbm_to_vmem [thread:$0]  (!%p3005_p12), %s266_s23, 25856, %s268_s25, [#allocation3], %s3211_s26, %s3211_s26, %s3212_s27  }
  0x15   : > { %3187 = dma.done.wait (%p3012_p9), [#allocation3], 25856  }
  0x16   : > { %3189 = vsyncadd (%p3012_p9), [#allocation3], 4294941440  ;;  %v3213_v0 = vmov 1   ;;  %v3214_v1 = vmov 3   ;;  %v3215_v2 = vmov 5   ;;  %v345_v3 = vld [vmem:[%s4441_s1] sm:$0xff] }
  0x17   : > { %3072 = vset.pattern.permute.xlu0 %v3213_v0  ;;  %3074 = vset.pattern.permute.xlu1 %v3214_v1  ;;  %v3216_v4 = vmov 2   ;;  %v3217_v5 = vmov 4   ;;  %v3218_v6 = vmov 6   ;;  %v3219_v7 = vmov 7   ;;  %p340_p13 = scmp.lt.s32.totalorder %s3306_s13, 1  ;;  %s3222_s23 = smov 127  }
  0x18   : > { %3076 = vset.pattern.permute.xlu2 %v3215_v2  ;;  %381 = vperm.xlu0 %3072, %v345_v3   ;;  %v3220_v8 = vmov 8   ;;  %v3221_v9 = vmov 0   ;;  %s3223_s24 = smov 126   ;;  %s3224_s25 = smov 98   ;;  %vm412_vm0 = vcmask 1039360   ;;  %vm465_vm1 = vcmask 1031168  }
  0x19   : > { %487 = vperm.xlu1 %3074, %v345_v3   ;;  %593 = vperm.xlu2 %3076, %v345_v3   ;;  %s341_s14 = scalar_select %p340_p13, %s3306_s13, 1  ;;  %vm518_vm2 = vcmask 801792   ;;  %vm571_vm3 = vcmask 793600   ;;  %vm624_vm4 = vcmask 785408   ;;  %vm683_vm5 = vcmask 556032  }
  0x1a   : > { %s3225_s26 = smov 97   ;;  %s3226_s27 = smov 96   ;;  %vm741_vm6 = vcmask 547840   ;;  %vm799_vm7 = vcmask 539648   ;;  %vm1129_vm8 = vcmask 1046528   ;;  %vm1125_vm9 = vcmask 318464  }
  0x1b   : > { %s2798_s16 = sshll.u32 %s341_s14, 3  ;;  %s3227_s28 = smov 68   ;;  %vm1430_vm10 = vcmask 64512   ;;  %vm1608_vm11 = vcmask 916480   ;;  %vm1675_vm12 = vcmask 908288   ;;  %vm1742_vm13 = vcmask 900096  }
  0x1c   : > { %s343_s22 = scalar_lea.vmem %s4440_s0, %s2798_s16  ;;  %s3228_s29 = smov 67   ;;  %vm1942_vm14 = vcmask 769024   ;;  %vm1875_vm15 = vcmask 777216  }
  0x1d   : > { %v3351_v10 = vld [vmem:[%s343_s22] sm:$0xff]  ;;  %s3229_s14 = smov 66   ;;  %s4450_s21 = smov 112  }
  0x1e   : > { %v3354_v11 = vperm.slane %v3351_v10, 3  ;;  %v3357_v12 = vperm.slane %v3351_v10, 2  ;;  %v3364_v16 = vperm.slane %v3351_v10, 5  ;;  %v3367_v17 = vperm.slane %v3351_v10, 4  ;;  %s3231_s22 = smov 111   ;;  %s4454_s17 = smov 112  }
  0x1f   : > { %v3395_v30 = vperm.slane %v3351_v10, 6  ;;  %v3415_v37 = vperm.slane %v3351_v10, 1  ;;  %v3418_v38 = vperm.slane %v3351_v10, 0 }
  0x20   : > { %3073 = vset.pattern.permute.xlu0 %v3216_v4 }
  0x21   : > { %3075 = vset.pattern.permute.xlu1 %v3217_v5  ;;  %434 = vperm.xlu0 %3073, %v345_v3  }
  0x22   : > { %540 = vperm.xlu1 %3075, %v345_v3   ;;  %3077 = vset.pattern.permute.xlu2 %v3218_v6 }
  0x23   : > { %646 = vperm.xlu2 %3077, %v345_v3  }
  0x29   : > { %3080 = vset.pattern.permute.xlu0 %v3221_v9 }
  0x2a   : > { %3078 = vset.pattern.permute.xlu1 %v3219_v7  ;;  %348 = vperm.xlu0 %3080, %v345_v3  }
  0x2b   : > { %706 = vperm.xlu1 %3078, %v345_v3   ;;  %3079 = vset.pattern.permute.xlu2 %v3220_v8 }
  0x2c   : > { %764 = vperm.xlu2 %3079, %v345_v3  }
  0x34   : > { %3081 = vset.pattern.permute.xlu2 %v3221_v9 }
  0x73   : > { %v3426_v42 = vpop.permute.xlu2 %593 }
  0x74   : > { %v599_v43 = vmul.f32 %v3426_v42, %v3354_v11  ;;  %v598_v44 = vmul.f32 %v3426_v42, %v3357_v12  ;;  %v600_v45 = vmul.f32 %v3426_v42, %v3367_v17  ;;  %v601_v47 = vmul.f32 %v3426_v42, %v3364_v16 }
  0x75   : > { %v602_v4 = vmul.f32 %v3426_v42, %v3395_v30 }
  0x7d   : > { %v3444_v49 = vpop.permute.xlu2 %646 }
  0x7e   : > { %v653_v50 = vmul.f32 %v3444_v49, %v3357_v12  ;;  %v654_v51 = vmul.f32 %v3444_v49, %v3354_v11  ;;  %v656_v53 = vmul.f32 %v3444_v49, %v3364_v16  ;;  %v655_v54 = vmul.f32 %v3444_v49, %v3367_v17 }
  0x86   : > { %v3463_v56 = vpop.permute.xlu2 %764 }
  0x87   : > { %v770_v6 = vmul.f32 %v3463_v56, %v3354_v11  ;;  %v769_v7 = vmul.f32 %v3463_v56, %v3357_v12  ;;  %v771_v9 = vmul.f32 %v3463_v56, %v3367_v17 }
  0x8a   : > { %v382_v13 = vpop.permute.xlu0 %381 }
  0x8b   : > { %v387_v14 = vmul.f32 %v382_v13, %v3354_v11  ;;  %v386_v15 = vmul.f32 %v382_v13, %v3357_v12  ;;  %v389_v19 = vmul.f32 %v382_v13, %v3364_v16  ;;  %v388_v20 = vmul.f32 %v382_v13, %v3367_v17  ;;  %v3380_v25 = vpop.permute.xlu1 %487 }
  0x8c   : > { %v493_v26 = vmul.f32 %v3380_v25, %v3354_v11  ;;  %v492_v27 = vmul.f32 %v3380_v25, %v3357_v12  ;;  %v494_v28 = vmul.f32 %v3380_v25, %v3367_v17  ;;  %v390_v32 = vmul.f32 %v382_v13, %v3395_v30 }
  0x8d   : > { %404 = vrot.lane.b32.xlu2 %v387_v14, %s3222_s23  ;;  %402 = vrot.lane.b32.xlu1 %v386_v15, %s3222_s23  ;;  %v495_v33 = vmul.f32 %v3380_v25, %v3364_v16  ;;  %v385_v39 = vmul.f32 %v382_v13, %v3415_v37  ;;  %v384_v40 = vmul.f32 %v382_v13, %v3418_v38 }
  0x8e   : > { %v496_v52 = vmul.f32 %v3380_v25, %v3395_v30  ;;  %v490_v55 = vmul.f32 %v3380_v25, %v3418_v38  ;;  %v491_v60 = vmul.f32 %v3380_v25, %v3415_v37 }
  0x93   : > { %v435_v18 = vpop.permute.xlu0 %434 }
  0x94   : > { %v439_v21 = vmul.f32 %v435_v18, %v3357_v12  ;;  %v441_v22 = vmul.f32 %v435_v18, %v3367_v17  ;;  %v440_v23 = vmul.f32 %v435_v18, %v3354_v11  ;;  %v442_v24 = vmul.f32 %v435_v18, %v3364_v16  ;;  %v3392_v29 = vpop.permute.xlu1 %540 }
  0x95   : > { %408 = vrot.lane.b32.xlu2 %v389_v19, %s3222_s23  ;;  %406 = vrot.lane.b32.xlu1 %v388_v20, %s3222_s23  ;;  %v545_v31 = vmul.f32 %v3392_v29, %v3357_v12  ;;  %v547_v34 = vmul.f32 %v3392_v29, %v3367_v17  ;;  %v546_v35 = vmul.f32 %v3392_v29, %v3354_v11 }
  0x96   : > { %455 = vrot.lane.b32.xlu0 %v439_v21, %s3223_s24  ;;  %v548_v36 = vmul.f32 %v3392_v29, %v3364_v16  ;;  %v443_v41 = vmul.f32 %v435_v18, %v3395_v30  ;;  %v437_v46 = vmul.f32 %v435_v18, %v3418_v38  ;;  %v438_v48 = vmul.f32 %v435_v18, %v3415_v37 }
  0x97   : > { %v549_v59 = vmul.f32 %v3392_v29, %v3395_v30  ;;  %v544_v2 = vmul.f32 %v3392_v29, %v3415_v37  ;;  %v543_v3 = vmul.f32 %v3392_v29, %v3418_v38  ;;  %v596_v20 = vmul.f32 %v3426_v42, %v3418_v38 }
  0x98   : > { %v772_v21 = vmul.f32 %v3463_v56, %v3364_v16 }
  0x9c   : > { %v3499_v8 = vpop.permute.xlu0 %348 }
  0x9d   : > { %459 = vrot.lane.b32.xlu2 %v441_v22, %s3223_s24  ;;  %457 = vrot.lane.b32.xlu1 %v440_v23, %s3223_s24  ;;  %v3466_v57 = vpop.permute.xlu1 %706  ;;  %v368_v13 = vmul.f32 %v3357_v12, %v3499_v8  ;;  %v597_v22 = vmul.f32 %v3426_v42, %v3415_v37  ;;  %v371_v23 = vmul.f32 %v3364_v16, %v3499_v8 }
  0x9e   : > { %461 = vrot.lane.b32.xlu0 %v442_v24, %s3223_s24  ;;  %v711_v58 = vmul.f32 %v3466_v57, %v3357_v12  ;;  %v713_v62 = vmul.f32 %v3466_v57, %v3367_v17  ;;  %v712_v63 = vmul.f32 %v3466_v57, %v3354_v11  ;;  %v714_v0 = vmul.f32 %v3466_v57, %v3364_v16 }
  0x9f   : > { %v372_v12 = vmul.f32 %v3395_v30, %v3499_v8  ;;  %v369_v25 = vmul.f32 %v3354_v11, %v3499_v8  ;;  %v821_v11 = vld [vmem:[%s4442_s2] sm:$0xff] }
  0xa5   : > { %510 = vrot.lane.b32.xlu2 %v493_v26, %s3224_s25  ;;  %508 = vrot.lane.b32.xlu1 %v492_v27, %s3224_s25  ;;  %v370_v26 = vmul.f32 %v3367_v17, %v3499_v8  ;;  %v657_v17 = vmul.f32 %v3444_v49, %v3395_v30 }
  0xa6   : > { %512 = vrot.lane.b32.xlu0 %v494_v28, %s3224_s25 }
  0xad   : > { %410 = vrot.lane.b32.xlu2 %v390_v32, %s3222_s23  ;;  %514 = vrot.lane.b32.xlu1 %v495_v33, %s3224_s25 }
  0xae   : > { %561 = vrot.lane.b32.xlu0 %v545_v31, %s3225_s26 }
  0xb5   : > { %565 = vrot.lane.b32.xlu2 %v547_v34, %s3225_s26  ;;  %563 = vrot.lane.b32.xlu1 %v546_v35, %s3225_s26 }
  0xb6   : > { %567 = vrot.lane.b32.xlu0 %v548_v36, %s3225_s26  ;;  %v651_v36 = vmul.f32 %v3444_v49, %v3418_v38 }
  0xbd   : > { %400 = vrot.lane.b32.xlu2 %v385_v39, %s3222_s23  ;;  %398 = vrot.lane.b32.xlu1 %v384_v40, %s3222_s23 }
  0xbe   : > { %463 = vrot.lane.b32.xlu0 %v443_v41, %s3223_s24 }
  0xc5   : > { %616 = vrot.lane.b32.xlu2 %v599_v43, %s3226_s27  ;;  %614 = vrot.lane.b32.xlu1 %v598_v44, %s3226_s27  ;;  %v649_v44 = vperm.slane %v3351_v10, 7 }
  0xc6   : > { %618 = vrot.lane.b32.xlu0 %v600_v45, %s3226_s27 }
  0xcd   : > { %451 = vrot.lane.b32.xlu2 %v437_v46, %s3223_s24  ;;  %620 = vrot.lane.b32.xlu1 %v601_v47, %s3226_s27 }
  0xce   : > { %453 = vrot.lane.b32.xlu0 %v438_v48, %s3223_s24 }
  0xd5   : > { %671 = vrot.lane.b32.xlu2 %v653_v50, %s3227_s28  ;;  %516 = vrot.lane.b32.xlu1 %v496_v52, %s3224_s25  ;;  %v715_v50 = vmul.f32 %v3466_v57, %v3395_v30  ;;  %v658_v52 = vmul.f32 %v649_v44, %v3444_v49 }
  0xd6   : > { %673 = vrot.lane.b32.xlu0 %v654_v51, %s3227_s28  ;;  %v652_v51 = vmul.f32 %v3444_v49, %v3415_v37 }
  0xdd   : > { %677 = vrot.lane.b32.xlu2 %v656_v53, %s3227_s28  ;;  %675 = vrot.lane.b32.xlu1 %v655_v54, %s3227_s28  ;;  %v367_v54 = vmul.f32 %v3415_v37, %v3499_v8 }
  0xde   : > { %504 = vrot.lane.b32.xlu0 %v490_v55, %s3224_s25 }
  0xe5   : > { %569 = vrot.lane.b32.xlu2 %v549_v59, %s3225_s26  ;;  %506 = vrot.lane.b32.xlu1 %v491_v60, %s3224_s25 }
  0xe6   : > { %729 = vrot.lane.b32.xlu0 %v711_v58, %s3228_s29 }
  0xe7   : > { %v405_v61 = vpop.permute.xlu2 %404 }
  0xed   : > { %733 = vrot.lane.b32.xlu2 %v713_v62, %s3228_s29  ;;  %731 = vrot.lane.b32.xlu1 %v712_v63, %s3228_s29  ;;  %v710_v63 = vmul.f32 %v3466_v57, %v3415_v37 }
  0xee   : > { %735 = vrot.lane.b32.xlu0 %v714_v0, %s3228_s29  ;;  %v709_v0 = vmul.f32 %v3466_v57, %v3418_v38 }
  0xef   : > { %v409_v1 = vpop.permute.xlu2 %408 }
  0xf5   : > { %559 = vrot.lane.b32.xlu2 %v544_v2, %s3225_s26  ;;  %557 = vrot.lane.b32.xlu1 %v543_v3, %s3225_s26  ;;  %s3233_s26 = smov 110  }
  0xf6   : > { %622 = vrot.lane.b32.xlu0 %v602_v4, %s3226_s27 }
  0xf7   : > { %v460_v5 = vpop.permute.xlu2 %459 }
  0xfd   : > { %789 = vrot.lane.b32.xlu2 %v770_v6, %s3229_s14  ;;  %787 = vrot.lane.b32.xlu1 %v769_v7, %s3229_s14  ;;  %v767_v7 = vmul.f32 %v3463_v56, %v3418_v38 }
  0xfe   : > { %791 = vrot.lane.b32.xlu0 %v771_v9, %s3229_s14  ;;  %v716_v9 = vmul.f32 %v3466_v57, %v649_v44 }
  0xff   : > { %v511_v14 = vpop.permute.xlu2 %510  ;;  %v403_v15 = vpop.permute.xlu1 %402 }
 0x100   : > { %v415_v18 = vsel %vm412_vm0, %v403_v15, %v405_v61 }
 0x101   : > { %v428_v19 = vadd.f32 %v415_v18, %v368_v13 }
 0x105   : > { %610 = vrot.lane.b32.xlu2 %v596_v20, %s3226_s27  ;;  %793 = vrot.lane.b32.xlu1 %v772_v21, %s3229_s14 }
 0x106   : > { %612 = vrot.lane.b32.xlu0 %v597_v22, %s3226_s27 }
 0x107   : > { %v411_v24 = vpop.permute.xlu2 %410  ;;  %v407_v27 = vpop.permute.xlu1 %406 }
 0x108   : > { %v418_v28 = vsel %vm412_vm0, %v409_v1, %v411_v24  ;;  %v3527_v29 = vadd.f32 %v411_v24, %v372_v12  ;;  %v416_v31 = vsel %vm412_vm0, %v405_v61, %v407_v27  ;;  %v417_v32 = vsel %vm412_vm0, %v407_v27, %v409_v1  ;;  %v3531_v33 = vpop.permute.xlu0 %455 }
 0x109   : > { %v3533_v34 = vadd.f32 %v418_v28, %v371_v23  ;;  %v429_v16 = vadd.f32 %v416_v31, %v369_v25  ;;  %v430_v35 = vadd.f32 %v417_v32, %v370_v26  ;;  %v773_v1 = vmul.f32 %v3463_v56, %v3395_v30 }
 0x10a   : > { %v768_v30 = vmul.f32 %v3463_v56, %v3415_v37  ;;  %v774_v37 = vmul.f32 %v3463_v56, %v649_v44  ;;  %v366_v24 = vmul.f32 %v3418_v38, %v3499_v8 }
 0x10d   : > { %824 = vperm.xlu2 %3081, %v821_v11   ;;  %679 = vrot.lane.b32.xlu1 %v657_v17, %s3227_s28 }
 0x10e   : > { %667 = vrot.lane.b32.xlu0 %v651_v36, %s3227_s28 }
 0x10f   : > { %v566_v39 = vpop.permute.xlu2 %565  ;;  %v458_v40 = vpop.permute.xlu1 %457 }
 0x110   : > { %v468_v41 = vsel %vm465_vm1, %v3531_v33, %v458_v40  ;;  %v469_v42 = vsel %vm465_vm1, %v458_v40, %v460_v5  ;;  %v462_v43 = vpop.permute.xlu0 %461 }
 0x111   : > { %v481_v45 = vadd.f32 %v468_v41, %v428_v19  ;;  %v482_v46 = vadd.f32 %v469_v42, %v429_v16  ;;  %v470_v47 = vsel %vm465_vm1, %v460_v5, %v462_v43 }
 0x112   : > { %v483_v48 = vadd.f32 %v470_v47, %v430_v35 }
 0x115   : > { %737 = vrot.lane.b32.xlu2 %v715_v50, %s3228_s29  ;;  %669 = vrot.lane.b32.xlu1 %v652_v51, %s3227_s28 }
 0x116   : > { %681 = vrot.lane.b32.xlu0 %v658_v52, %s3227_s28  ;;  %s3234_s28 = smov 94  }
 0x117   : > { %v3557_v10 = vpop.permute.xlu1 %508  ;;  %v401_v53 = vpop.permute.xlu2 %400 }
 0x118   : > { %v521_v55 = vsel %vm518_vm2, %v3557_v10, %v511_v14  ;;  %v414_v58 = vsel %vm412_vm0, %v401_v53, %v403_v15  ;;  %v513_v59 = vpop.permute.xlu0 %512 }
 0x119   : > { %v534_v49 = vadd.f32 %v521_v55, %v481_v45  ;;  %v427_v60 = vadd.f32 %v414_v58, %v367_v54  ;;  %v522_v61 = vsel %vm518_vm2, %v511_v14, %v513_v59 }
 0x11a   : > { %v535_v62 = vadd.f32 %v522_v61, %v482_v46 }
 0x11d   : > { %727 = vrot.lane.b32.xlu2 %v710_v63, %s3228_s29  ;;  %725 = vrot.lane.b32.xlu1 %v709_v0, %s3228_s29 }
 0x11e   : > { %795 = vrot.lane.b32.xlu0 %v773_v1, %s3229_s14 }
 0x11f   : > { %v515_v2 = vpop.permute.xlu1 %514  ;;  %v3574_v3 = vpop.permute.xlu2 %616 }
 0x120   : > { %v523_v4 = vsel %vm518_vm2, %v513_v59, %v515_v2  ;;  %v562_v5 = vpop.permute.xlu0 %561 }
 0x121   : > { %v536_v6 = vadd.f32 %v523_v4, %v483_v48 }
 0x125   : > { %783 = vrot.lane.b32.xlu2 %v767_v7, %s3229_s14  ;;  %739 = vrot.lane.b32.xlu1 %v716_v9, %s3228_s29 }
 0x126   : > { %785 = vrot.lane.b32.xlu0 %v768_v30, %s3229_s14 }
 0x127   : > { %v564_v13 = vpop.permute.xlu1 %563  ;;  %v452_v14 = vpop.permute.xlu2 %451 }
 0x128   : > { %v574_v15 = vsel %vm571_vm3, %v562_v5, %v564_v13  ;;  %v575_v18 = vsel %vm571_vm3, %v564_v13, %v566_v39  ;;  %v568_v19 = vpop.permute.xlu0 %567 }
 0x129   : > { %v587_v20 = vadd.f32 %v574_v15, %v534_v49  ;;  %v588_v21 = vadd.f32 %v575_v18, %v535_v62  ;;  %v576_v57 = vsel %vm571_vm3, %v566_v39, %v568_v19 }
 0x12a   : > { %v589_v22 = vadd.f32 %v576_v57, %v536_v6 }
 0x12d   : > { %797 = vrot.lane.b32.xlu1 %v774_v37, %s3229_s14 }
 0x12f   : > { %v3590_v12 = vpop.permute.xlu2 %671  ;;  %v399_v23 = vpop.permute.xlu1 %398 }
 0x130   : > { %v413_v25 = vsel %vm412_vm0, %v399_v23, %v401_v53  ;;  %v464_v26 = vpop.permute.xlu0 %463 }
 0x131   : > { %v426_v27 = vadd.f32 %v413_v25, %v366_v24  ;;  %v471_v28 = vsel %vm465_vm1, %v462_v43, %v464_v26  ;;  %v485_v31 = vadd.f32 %v464_v26, %v3527_v29 }
 0x132   : > { %v484_v32 = vadd.f32 %v471_v28, %v3533_v34 }
 0x137   : > { %v3598_v16 = vpop.permute.xlu2 %677  ;;  %v3600_v56 = vpop.permute.xlu1 %614 }
 0x138   : > { %v619_v35 = vpop.permute.xlu0 %618  ;;  %v627_v0 = vsel %vm624_vm4, %v3600_v56, %v3574_v3 }
 0x139   : > { %v640_v7 = vadd.f32 %v627_v0, %v587_v20 }
 0x13f   : > { %v621_v11 = vpop.permute.xlu1 %620  ;;  %v570_v17 = vpop.permute.xlu2 %569 }
 0x140   : > { %v629_v38 = vsel %vm624_vm4, %v619_v35, %v621_v11  ;;  %v454_v8 = vpop.permute.xlu0 %453  ;;  %v577_v46 = vsel %vm571_vm3, %v568_v19, %v570_v17 }
 0x141   : > { %v3603_v36 = vadd.f32 %v629_v38, %v589_v22  ;;  %v466_v39 = vsel %vm465_vm1, %v452_v14, %v454_v8  ;;  %v467_v29 = vsel %vm465_vm1, %v454_v8, %v3531_v33 }
 0x142   : > { %v3608_v40 = vadd.f32 %v466_v39, %v426_v27  ;;  %v480_v34 = vadd.f32 %v467_v29, %v427_v60 }
 0x147   : > { %v517_v41 = vpop.permute.xlu1 %516  ;;  %v734_v47 = vpop.permute.xlu2 %733 }
 0x148   : > { %v524_v42 = vsel %vm518_vm2, %v515_v2, %v517_v41  ;;  %v538_v43 = vadd.f32 %v517_v41, %v485_v31  ;;  %v674_v44 = vpop.permute.xlu0 %673 }
 0x149   : > { %v537_v45 = vadd.f32 %v524_v42, %v484_v32 }
 0x14a   : > { %v3612_v48 = vadd.f32 %v570_v17, %v538_v43 }
 0x14b   : > { %v590_v50 = vadd.f32 %v577_v46, %v537_v45 }
 0x14f   : > { %v676_v51 = vpop.permute.xlu1 %675  ;;  %v560_v53 = vpop.permute.xlu2 %559 }
 0x150   : > { %v505_v52 = vpop.permute.xlu0 %504  ;;  %v573_v59 = vsel %vm571_vm3, %v560_v53, %v562_v5  ;;  %v686_v5 = vsel %vm683_vm5, %v3590_v12, %v674_v44  ;;  %v687_v9 = vsel %vm683_vm5, %v674_v44, %v676_v51  ;;  %v688_v8 = vsel %vm683_vm5, %v676_v51, %v3598_v16 }
 0x151   : > { %v700_v14 = vadd.f32 %v686_v5, %v640_v7  ;;  %v702_v42 = vadd.f32 %v688_v8, %v3603_v36 }
 0x157   : > { %v507_v54 = vpop.permute.xlu1 %506  ;;  %v790_v60 = vpop.permute.xlu2 %789 }
 0x158   : > { %v520_v33 = vsel %vm518_vm2, %v507_v54, %v3557_v10  ;;  %v3616_v55 = vpop.permute.xlu0 %729  ;;  %v628_v10 = vsel %vm624_vm4, %v3574_v3, %v619_v35  ;;  %v519_v46 = vsel %vm518_vm2, %v505_v52, %v507_v54 }
 0x159   : > { %v533_v58 = vadd.f32 %v520_v33, %v480_v34  ;;  %v641_v30 = vadd.f32 %v628_v10, %v588_v21 }
 0x15b   : > { %v3619_v49 = vadd.f32 %v573_v59, %v533_v58  ;;  %v701_v3 = vadd.f32 %v687_v9, %v641_v30 }
 0x15f   : > { %v732_v61 = vpop.permute.xlu1 %731  ;;  %v611_v1 = vpop.permute.xlu2 %610 }
 0x160   : > { %v736_v62 = vpop.permute.xlu0 %735  ;;  %v744_v13 = vsel %vm741_vm6, %v3616_v55, %v732_v61  ;;  %v745_v15 = vsel %vm741_vm6, %v732_v61, %v734_v47 }
 0x161   : > { %v758_v18 = vadd.f32 %v744_v13, %v700_v14  ;;  %v759_v57 = vadd.f32 %v745_v15, %v701_v3  ;;  %v746_v34 = vsel %vm741_vm6, %v734_v47, %v736_v62 }
 0x162   : > { %v760_v44 = vadd.f32 %v746_v34, %v702_v42  ;;  %v953_v34 = vld [vmem:[#allocation2 + $0xf0] sm:$0xff] }
 0x163   : > { %v981_v42 = vld [vmem:[#allocation2 + $0x1d0] sm:$0xff]  ;;  %1136 = vmatpush.msra.mxu0 %v953_v34 }
 0x167   : > { %v558_v63 = vpop.permute.xlu1 %557  ;;  %v3638_v24 = vpop.permute.xlu2 %824 }
 0x168   : > { %v3624_v2 = vpop.permute.xlu0 %622  ;;  %v572_v58 = vsel %vm571_vm3, %v558_v63, %v560_v53  ;;  %vm2166_vm3 = vcmask 400384  }
 0x169   : > { %v630_v4 = vsel %vm624_vm4, %v621_v11, %v3624_v2 }
 0x16a   : > { %v643_v6 = vadd.f32 %v630_v4, %v590_v50 }
 0x16f   : > { %v788_v19 = vpop.permute.xlu1 %787  ;;  %v738_v38 = vpop.permute.xlu2 %737 }
 0x170   : > { %v802_v22 = vsel %vm799_vm7, %v788_v19, %v790_v60  ;;  %v792_v37 = vpop.permute.xlu0 %791  ;;  %v747_v51 = vsel %vm741_vm6, %v736_v62, %v738_v38 }
 0x171   : > { %v816_v23 = vadd.f32 %v802_v22, %v758_v18  ;;  %v803_v20 = vsel %vm799_vm7, %v790_v60, %v792_v37 }
 0x172   : > { %v817_v21 = vadd.f32 %v803_v20, %v759_v57 }
 0x173   : > { %v3641_v25 = vadd.f32 %v3638_v24, %v816_v23 }
 0x174   : > { %v3644_v26 = vadd.f32 %v3638_v24, %v817_v21 }
 0x175   : > { %v836_v27 = vmax.f32 %v3641_v25, 0.0  ;;  %v1035_v25 = vld [vmem:[#allocation2 + $0x380] sm:$0xff] }
 0x176   : > { %v837_v28 = vmax.f32 %v3644_v26, 0.0  ;;  %v937_v26 = vld [vmem:[#allocation2 + $0x70] sm:$0xff] }
 0x177   : > { %v794_v31 = vpop.permute.xlu1 %793  ;;  %v728_v50 = vpop.permute.xlu2 %727 }
 0x178   : > { %v613_v32 = vpop.permute.xlu0 %612  ;;  %v3082_v35 = vpack.i.bf16 %v837_v28, %v836_v27  ;;  %v804_v43 = vsel %vm799_vm7, %v792_v37, %v794_v31  ;;  %v743_v7 = vsel %vm741_vm6, %v728_v50, %v3616_v55  ;;  %v644_v55 = vadd.f32 %v3624_v2, %v3612_v48 }
 0x179   : > { %v818_v33 = vadd.f32 %v804_v43, %v760_v44  ;;  %v626_v47 = vsel %vm624_vm4, %v613_v32, %v3600_v56  ;;  %v625_v61 = vsel %vm624_vm4, %v611_v1, %v613_v32  ;;  %v1049_v43 = vld [vmem:[#allocation2 + $0x3f0] sm:$0xff]  ;;  %v951_v44 = vld [vmem:[#allocation2 + $0xe0] sm:$0xff] }
 0x17a   : > { %3083 = vrot.lane.b32.xlu2 %v3082_v35, %s3222_s23  ;;  %v639_v62 = vadd.f32 %v626_v47, %v3619_v49  ;;  %1196 = vmatpush.msra.mxu3 %v1049_v43  ;;  %v977_v47 = vld [vmem:[#allocation2 + $0x1b0] sm:$0xff]  ;;  %v963_v43 = vld [vmem:[#allocation2 + $0x140] sm:$0xff] }
 0x17b   : > { %v3671_v53 = vadd.f32 %v3638_v24, %v818_v33  ;;  %1137 = vmatpush.msra.mxu0 %v951_v44 }
 0x17f   : > { %v680_v11 = vpop.permute.xlu1 %679  ;;  %v784_v49 = vpop.permute.xlu2 %783 }
 0x180   : > { %v668_v17 = vpop.permute.xlu0 %667  ;;  %v689_v41 = vsel %vm683_vm5, %v3598_v16, %v680_v11  ;;  %v532_v16 = vadd.f32 %v519_v46, %v3608_v40  ;;  %v979_v46 = vld [vmem:[#allocation2 + $0x1c0] sm:$0xff] }
 0x181   : > { %v703_v45 = vadd.f32 %v689_v41, %v643_v6 }
 0x182   : > { %v585_v54 = vadd.f32 %v572_v58, %v532_v16  ;;  %v945_v16 = vld [vmem:[#allocation2 + $0xb0] sm:$0xff] }
 0x183   : > { %v761_v36 = vadd.f32 %v747_v51, %v703_v45  ;;  %v949_v45 = vld [vmem:[#allocation2 + $0xd0] sm:$0xff]  ;;  %v947_v51 = vld [vmem:[#allocation2 + $0xc0] sm:$0xff] }
 0x184   : > { %v638_v10 = vadd.f32 %v625_v61, %v585_v54  ;;  %1138 = vmatpush.msra.mxu0 %v949_v45  ;;  %v1041_v61 = vld [vmem:[#allocation2 + $0x3b0] sm:$0xff]  ;;  %v943_v54 = vld [vmem:[#allocation2 + $0xa0] sm:$0xff] }
 0x185   : > { %v957_v45 = vld [vmem:[#allocation2 + $0x110] sm:$0xff] }
 0x186   : > { %1139 = vmatpush.msra.mxu0 %v947_v51  ;;  %v955_v51 = vld [vmem:[#allocation2 + $0x100] sm:$0xff] }
 0x187   : > { %v670_v39 = vpop.permute.xlu1 %669 }
 0x188   : > { %v682_v29 = vpop.permute.xlu0 %681  ;;  %v685_v0 = vsel %vm683_vm5, %v670_v39, %v3590_v12  ;;  %v684_v56 = vsel %vm683_vm5, %v668_v17, %v670_v39  ;;  %v838_v12 = vmax.f32 %v3671_v53, 0.0  ;;  %v985_v39 = vld [vmem:[#allocation2 + $0x1f0] sm:$0xff]  ;;  %1140 = vmatpush.msra.mxu0 %v945_v16  ;;  %v931_v53 = vld [vmem:[#allocation2 + $0x40] sm:$0xff] }
 0x189   : > { %v699_v40 = vadd.f32 %v685_v0, %v639_v62  ;;  %v698_v5 = vadd.f32 %v684_v56, %v638_v10  ;;  %v690_v57 = vsel %vm683_vm5, %v680_v11, %v682_v29  ;;  %v983_v29 = vld [vmem:[#allocation2 + $0x1e0] sm:$0xff]  ;;  %1156 = vmatpush.msra.mxu1 %v985_v39  ;;  %v1017_v62 = vld [vmem:[#allocation2 + $0x2f0] sm:$0xff] }
 0x18a   : > { %v1039_v56 = vld [vmem:[#allocation2 + $0x3a0] sm:$0xff]  ;;  %1176 = vmatpush.msra.mxu2 %v1017_v62  ;;  %1141 = vmatpush.msra.mxu0 %v943_v54  ;;  %v933_v39 = vld [vmem:[#allocation2 + $0x50] sm:$0xff] }
 0x18b   : > { %v757_v14 = vadd.f32 %v743_v7, %v699_v40  ;;  %1157 = vmatpush.msra.mxu1 %v983_v29  ;;  %v1015_v10 = vld [vmem:[#allocation2 + $0x2e0] sm:$0xff]  ;;  %v1109_v54 = vld [vmem:[#allocation2 + $0x5d0] sm:$0xff] }
 0x18c   : > { %1177 = vmatpush.msra.mxu2 %v1015_v10  ;;  %v1105_v62 = vld [vmem:[#allocation2 + $0x5b0] sm:$0xff]  ;;  %v1079_v10 = vld [vmem:[#allocation2 + $0x4e0] sm:$0xff] }
 0x18d   : > { %1158 = vmatpush.msra.mxu1 %v981_v42 }
 0x18f   : > { %v726_v59 = vpop.permute.xlu1 %725  ;;  %1159 = vmatpush.msra.mxu1 %v979_v46  ;;  %v927_v46 = vld [vmem:[#allocation2 + $0x20] sm:$0xff] }
 0x190   : > { %v796_v60 = vpop.permute.xlu0 %795  ;;  %v742_v1 = vsel %vm741_vm6, %v726_v59, %v728_v50  ;;  %v1045_v50 = vld [vmem:[#allocation2 + $0x3d0] sm:$0xff]  ;;  %v1043_v59 = vld [vmem:[#allocation2 + $0x3c0] sm:$0xff] }
 0x191   : > { %v805_v52 = vsel %vm799_vm7, %v794_v31, %v796_v60  ;;  %v756_v30 = vadd.f32 %v742_v1, %v698_v5  ;;  %v704_v31 = vadd.f32 %v690_v57, %v644_v55  ;;  %1160 = vmatpush.msra.mxu1 %v977_v47  ;;  %v941_v1 = vld [vmem:[#allocation2 + $0x90] sm:$0xff] }
 0x192   : > { %v819_v63 = vadd.f32 %v805_v52, %v761_v36  ;;  %v975_v36 = vld [vmem:[#allocation2 + $0x1a0] sm:$0xff]  ;;  %v1013_v5 = vld [vmem:[#allocation2 + $0x2d0] sm:$0xff]  ;;  %1142 = vmatpush.msra.mxu0 %v941_v1  ;;  %v952_v1 = vld [vmem:[#allocation2 + $0xe8] sm:$0xff] }
 0x193   : > { %1161 = vmatpush.msra.mxu1 %v975_v36  ;;  %1178 = vmatpush.msra.mxu2 %v1013_v5  ;;  %v1033_v57 = vld [vmem:[#allocation2 + $0x370] sm:$0xff]  ;;  %v923_v36 = vld [vmem:[#allocation2] sm:$0xff] }
 0x194   : > { %v3676_v4 = vadd.f32 %v3638_v24, %v819_v63  ;;  %v973_v63 = vld [vmem:[#allocation2 + $0x190] sm:$0xff] }
 0x195   : > { %1162 = vmatpush.msra.mxu1 %v973_v63  ;;  %v925_v47 = vld [vmem:[#allocation2 + $0x10] sm:$0xff]  ;;  %v954_v63 = vld [vmem:[#allocation2 + $0xf8] sm:$0xff] }
 0x196   : > { %v839_v6 = vmax.f32 %v3676_v4, 0.0  ;;  %v1107_v4 = vld [vmem:[#allocation2 + $0x5c0] sm:$0xff]  ;;  %v997_v5 = vld [vmem:[#allocation2 + $0x250] sm:$0xff] }
 0x197   : > { %v740_v9 = vpop.permute.xlu1 %739 }
 0x198   : > { %v786_v13 = vpop.permute.xlu0 %785  ;;  %v3087_v15 = vpack.i.bf16 %v839_v6, %v838_v12  ;;  %v748_v23 = vsel %vm741_vm6, %v738_v38, %v740_v9 }
 0x199   : > { %v800_v3 = vsel %vm799_vm7, %v784_v49, %v786_v13  ;;  %v801_v18 = vsel %vm799_vm7, %v786_v13, %v788_v19  ;;  %v762_v35 = vadd.f32 %v748_v23, %v704_v31  ;;  %v971_v49 = vld [vmem:[#allocation2 + $0x180] sm:$0xff]  ;;  %v1009_v31 = vld [vmem:[#allocation2 + $0x2b0] sm:$0xff] }
 0x19a   : > { %v814_v22 = vadd.f32 %v800_v3, %v756_v30  ;;  %v815_v37 = vadd.f32 %v801_v18, %v757_v14  ;;  %3088 = vrot.lane.b32.xlu0 %v3087_v15, %s3222_s23  ;;  %v1037_v30 = vld [vmem:[#allocation2 + $0x390] sm:$0xff]  ;;  %v939_v14 = vld [vmem:[#allocation2 + $0x80] sm:$0xff]  ;;  %1163 = vmatpush.msra.mxu1 %v971_v49 }
 0x19b   : > { %v969_v3 = vld [vmem:[#allocation2 + $0x170] sm:$0xff]  ;;  %v967_v18 = vld [vmem:[#allocation2 + $0x160] sm:$0xff]  ;;  %1143 = vmatpush.msra.mxu0 %v939_v14 }
 0x19c   : > { %v3695_v20 = vadd.f32 %v3638_v24, %v814_v22  ;;  %v3698_v21 = vadd.f32 %v3638_v24, %v815_v37  ;;  %1164 = vmatpush.msra.mxu1 %v969_v3  ;;  %v935_v23 = vld [vmem:[#allocation2 + $0x60] sm:$0xff]  ;;  %v1077_v49 = vld [vmem:[#allocation2 + $0x4d0] sm:$0xff] }
 0x19d   : > { %1144 = vmatpush.msra.mxu0 %v937_v26  ;;  %v995_v14 = vld [vmem:[#allocation2 + $0x240] sm:$0xff]  ;;  %v993_v26 = vld [vmem:[#allocation2 + $0x230] sm:$0xff] }
 0x19e   : > { %v834_v19 = vmax.f32 %v3695_v20, 0.0  ;;  %v835_v32 = vmax.f32 %v3698_v21, 0.0  ;;  %1165 = vmatpush.msra.mxu1 %v967_v18  ;;  %v961_v21 = vld [vmem:[#allocation2 + $0x130] sm:$0xff]  ;;  %v1099_v3 = vld [vmem:[#allocation2 + $0x580] sm:$0xff]  ;;  %v946_v18 = vld [vmem:[#allocation2 + $0xb8] sm:$0xff] }
 0x19f   : > { %v798_v11 = vpop.permute.xlu1 %797  ;;  %1145 = vmatpush.msra.mxu0 %v935_v23  ;;  %v989_v23 = vld [vmem:[#allocation2 + $0x210] sm:$0xff] }
 0x1a0   : > { %v806_v17 = vsel %vm799_vm7, %v796_v60, %v798_v11  ;;  %v3092_v48 = vpack.i.bf16 %v835_v32, %v834_v19  ;;  %v1031_v11 = vld [vmem:[#allocation2 + $0x360] sm:$0xff] }
 0x1a1   : > { %v820_v2 = vadd.f32 %v806_v17, %v762_v35  ;;  %v965_v35 = vld [vmem:[#allocation2 + $0x150] sm:$0xff]  ;;  %1146 = vmatpush.msra.mxu0 %v933_v39  ;;  %v1123_v39 = vld [vmem:[#allocation2 + $0x640] sm:$0x7f] }
 0x1a2   : > { %3093 = vrot.lane.b32.xlu1 %v3092_v48, %s3222_s23  ;;  %1166 = vmatpush.msra.mxu1 %v965_v35  ;;  %v1093_v35 = vld [vmem:[#allocation2 + $0x550] sm:$0xff] }
 0x1a3   : > { %v3709_v38 = vadd.f32 %v3638_v24, %v820_v2  ;;  %v1047_v24 = vld [vmem:[#allocation2 + $0x3e0] sm:$0xff]  ;;  %1147 = vmatpush.msra.mxu0 %v931_v53  ;;  %v938_v53 = vld [vmem:[#allocation2 + $0x78] sm:$0xff] }
 0x1a4   : > { %1197 = vmatpush.msra.mxu3 %v1047_v24  ;;  %1167 = vmatpush.msra.mxu1 %v963_v43  ;;  %v1005_v24 = vld [vmem:[#allocation2 + $0x290] sm:$0xff]  ;;  %v940_v43 = vld [vmem:[#allocation2 + $0x88] sm:$0xff] }
 0x1a5   : > { %v840_v8 = vmax.f32 %v3709_v38, 0.0  ;;  %v929_v38 = vld [vmem:[#allocation2 + $0x30] sm:$0xff] }
 0x1a6   : > { %1198 = vmatpush.msra.mxu3 %v1045_v50  ;;  %1168 = vmatpush.msra.mxu1 %v961_v21  ;;  %v1121_v21 = vld [vmem:[#allocation2 + $0x630] sm:$0xff] }
 0x1a7   : > { %860 = vrot.lane.b32.xlu2 %v840_v8, %s3222_s23  ;;  %1148 = vmatpush.msra.mxu0 %v929_v38  ;;  %v936_v38 = vld [vmem:[#allocation2 + $0x68] sm:$0xff] }
 0x1a8   : > { %1199 = vmatpush.msra.mxu3 %v1043_v59  ;;  %v1113_v59 = vld [vmem:[#allocation2 + $0x5f0] sm:$0xff] }
 0x1a9   : > { %1149 = vmatpush.msra.mxu0 %v927_v46  ;;  %v934_v46 = vld [vmem:[#allocation2 + $0x58] sm:$0xff] }
 0x1aa   : > { %1200 = vmatpush.msra.mxu3 %v1041_v61  ;;  %v1111_v61 = vld [vmem:[#allocation2 + $0x5e0] sm:$0xff] }
 0x1ab   : > { %1150 = vmatpush.msra.mxu0 %v925_v47  ;;  %v1057_v47 = vld [vmem:[#allocation2 + $0x430] sm:$0xff] }
 0x1ac   : > { %1201 = vmatpush.msra.mxu3 %v1039_v56  ;;  %v999_v56 = vld [vmem:[#allocation2 + $0x260] sm:$0xff] }
 0x1ad   : > { %1151 = vmatpush.msra.mxu0 %v923_v36  ;;  %v928_v36 = vld [vmem:[#allocation2 + $0x28] sm:$0xff] }
 0x1ae   : > { %1202 = vmatpush.msra.mxu3 %v1037_v30  ;;  %v1101_v30 = vld [vmem:[#allocation2 + $0x590] sm:$0xff] }
 0x1b0   : > { %1203 = vmatpush.msra.mxu3 %v1035_v25  ;;  %v948_v25 = vld [vmem:[#allocation2 + $0xc8] sm:$0xff] }
 0x1b2   : > { %1204 = vmatpush.msra.mxu3 %v1033_v57  ;;  %v991_v57 = vld [vmem:[#allocation2 + $0x220] sm:$0xff] }
 0x1b4   : > { %1205 = vmatpush.msra.mxu3 %v1031_v11  ;;  %v942_v11 = vld [vmem:[#allocation2 + $0x98] sm:$0xff] }
 0x1d4   : > { %v3715_v41 = vpop.permute.xlu2 %3083 }
 0x1d5   : > { %v3086_v33 = vunpack.i.h.bf16 %v3715_v41  ;;  %v3085_v58 = vunpack.i.l.bf16 %v3715_v41  ;;  %v1029_v41 = vld [vmem:[#allocation2 + $0x350] sm:$0xff] }
 0x1d6   : > { %1206 = vmatpush.msra.mxu3 %v1029_v41  ;;  %v1065_v41 = vld [vmem:[#allocation2 + $0x470] sm:$0xff] }
 0x1d7   : > { %v864_v0 = vsel %vm412_vm0, %v3085_v58, %v3086_v33 }
 0x1d8   : > { %v3728_v7 = vmax.f32 %v836_v27, %v864_v0  ;;  %v1011_v27 = vld [vmem:[#allocation2 + $0x2c0] sm:$0xff]  ;;  %v1001_v0 = vld [vmem:[#allocation2 + $0x270] sm:$0xff] }
 0x1d9   : > { %1179 = vmatpush.msra.mxu2 %v1011_v27  ;;  %v1073_v27 = vld [vmem:[#allocation2 + $0x4b0] sm:$0xff] }
 0x1db   : > { %1180 = vmatpush.msra.mxu2 %v1009_v31  ;;  %v1069_v31 = vld [vmem:[#allocation2 + $0x490] sm:$0xff] }
 0x201   : > { %v861_v17 = vpop.permute.xlu2 %860 }
 0x202   : > { %v3759_v44 = vmax.f32 %v840_v8, %v861_v17  ;;  %v1025_v8 = vld [vmem:[#allocation2 + $0x330] sm:$0xff] }
 0x20c   : > { %v3719_v60 = vpop.permute.xlu0 %3088 }
 0x20d   : > { %v3090_v52 = vunpack.i.l.bf16 %v3719_v60  ;;  %v3091_v13 = vunpack.i.h.bf16 %v3719_v60  ;;  %v1021_v60 = vld [vmem:[#allocation2 + $0x310] sm:$0xff] }
 0x20f   : > { %v865_v40 = vsel %vm412_vm0, %v3086_v33, %v3090_v52  ;;  %v866_v22 = vsel %vm412_vm0, %v3090_v52, %v3091_v13  ;;  %v867_v50 = vsel %vm412_vm0, %v3091_v13, %v861_v17  ;;  %v1023_v33 = vld [vmem:[#allocation2 + $0x320] sm:$0xff]  ;;  %v950_v13 = vld [vmem:[#allocation2 + $0xd8] sm:$0xff] }
 0x210   : > { %v3732_v9 = vmax.f32 %v837_v28, %v865_v40  ;;  %v3755_v42 = vmax.f32 %v838_v12, %v866_v22  ;;  %v1027_v12 = vld [vmem:[#allocation2 + $0x340] sm:$0xff]  ;;  %v3773_v16 = vmax.f32 %v839_v6, %v867_v50  ;;  %v1081_v6 = vld [vmem:[#allocation2 + $0x4f0] sm:$0xff] }
 0x211   : > { %1207 = vmatpush.msra.mxu3 %v1027_v12  ;;  %v1019_v52 = vld [vmem:[#allocation2 + $0x300] sm:$0xff]  ;;  %1216 = vmatpush.msrb.mxu0 %v1081_v6 }
 0x212   : > { %v3097_v15 = vpack.i.bf16 %v3732_v9, %v3728_v7  ;;  %v1103_v40 = vld [vmem:[#allocation2 + $0x5a0] sm:$0xff] }
 0x213   : > { %1208 = vmatpush.msra.mxu3 %v1025_v8  ;;  %1217 = vmatpush.msrb.mxu0 %v1079_v10  ;;  %v1071_v22 = vld [vmem:[#allocation2 + $0x4a0] sm:$0xff]  ;;  %v1061_v8 = vld [vmem:[#allocation2 + $0x450] sm:$0xff] }
 0x214   : > { %3098 = vrot.lane.b32.xlu0 %v3097_v15, %s3224_s25  ;;  %v3094_v28 = vpop.permute.xlu1 %3093  ;;  %v1075_v15 = vld [vmem:[#allocation2 + $0x4c0] sm:$0xff] }
 0x215   : > { %v3096_v37 = vunpack.i.h.bf16 %v3094_v28  ;;  %v3095_v55 = vunpack.i.l.bf16 %v3094_v28  ;;  %1209 = vmatpush.msra.mxu3 %v1023_v33  ;;  %1218 = vmatpush.msrb.mxu0 %v1077_v49  ;;  %v1097_v28 = vld [vmem:[#allocation2 + $0x570] sm:$0xff]  ;;  %v987_v17 = vld [vmem:[#allocation2 + $0x200] sm:$0xff]  ;;  %v1050_v49 = vld [vmem:[#allocation2 + $0x3f8] sm:$0xff] }
 0x216   : > { %v1063_v12 = vld [vmem:[#allocation2 + $0x460] sm:$0xff] }
 0x217   : > { %v862_v48 = vsel %vm412_vm0, %v3095_v55, %v3096_v37  ;;  %v863_v2 = vsel %vm412_vm0, %v3096_v37, %v3085_v58  ;;  %v1003_v58 = vld [vmem:[#allocation2 + $0x280] sm:$0xff]  ;;  %1210 = vmatpush.msra.mxu3 %v1021_v60  ;;  %1219 = vmatpush.msrb.mxu0 %v1075_v15  ;;  %v944_v55 = vld [vmem:[#allocation2 + $0xa8] sm:$0xff]  ;;  %v982_v15 = vld [vmem:[#allocation2 + $0x1d8] sm:$0xff] }
 0x218   : > { %v3747_v29 = vmax.f32 %v835_v32, %v863_v2  ;;  %v3751_v34 = vmax.f32 %v834_v19, %v862_v48  ;;  %v1007_v19 = vld [vmem:[#allocation2 + $0x2a0] sm:$0xff] }
 0x219   : > { %v959_v32 = vld [vmem:[#allocation2 + $0x120] sm:$0xff]  ;;  %1181 = vmatpush.msra.mxu2 %v1007_v19  ;;  %1211 = vmatpush.msra.mxu3 %v1019_v52 }
 0x21a   : > { %891 = vrot.lane.b32.xlu2 %v3747_v29, %s3224_s25  ;;  %v3102_v20 = vpack.i.bf16 %v3751_v34, %v3755_v42  ;;  %1169 = vmatpush.msra.mxu1 %v959_v32  ;;  %v1095_v37 = vld [vmem:[#allocation2 + $0x560] sm:$0xff] }
 0x21b   : > { %1182 = vmatpush.msra.mxu2 %v1005_v24  ;;  %1276 = vmatpush.msrb.mxu3 %v954_v63  ;;  %v1067_v48 = vld [vmem:[#allocation2 + $0x480] sm:$0xff]  ;;  %v1085_v24 = vld [vmem:[#allocation2 + $0x510] sm:$0xff] }
 0x21c   : > { %901 = vrot.lane.b32.xlu0 %v3759_v44, %s3224_s25  ;;  %3103 = vrot.lane.b32.xlu1 %v3102_v20, %s3224_s25  ;;  %v1091_v2 = vld [vmem:[#allocation2 + $0x540] sm:$0xff]  ;;  %v1089_v20 = vld [vmem:[#allocation2 + $0x530] sm:$0xff] }
 0x21d   : > { %1170 = vmatpush.msra.mxu1 %v957_v45  ;;  %1183 = vmatpush.msra.mxu2 %v1003_v58  ;;  %v1087_v19 = vld [vmem:[#allocation2 + $0x520] sm:$0xff]  ;;  %v1117_v45 = vld [vmem:[#allocation2 + $0x610] sm:$0xff] }
 0x21e   : > { %1277 = vmatpush.msrb.mxu3 %v952_v1  ;;  %1220 = vmatpush.msrb.mxu0 %v1073_v27  ;;  %v1119_v32 = vld [vmem:[#allocation2 + $0x620] sm:$0xff]  ;;  %v1044_v27 = vld [vmem:[#allocation2 + $0x3c8] sm:$0xff] }
 0x21f   : > { %1171 = vmatpush.msra.mxu1 %v955_v51  ;;  %1184 = vmatpush.msra.mxu2 %v1001_v0  ;;  %v1059_v50 = vld [vmem:[#allocation2 + $0x440] sm:$0xff]  ;;  %v932_v51 = vld [vmem:[#allocation2 + $0x48] sm:$0xff]  ;;  %v926_v0 = vld [vmem:[#allocation2 + $0x18] sm:$0xff] }
 0x220   : > { %1278 = vmatpush.msrb.mxu3 %v950_v13  ;;  %1221 = vmatpush.msrb.mxu0 %v1071_v22  ;;  %v1083_v33 = vld [vmem:[#allocation2 + $0x500] sm:$0xff]  ;;  %v1048_v13 = vld [vmem:[#allocation2 + $0x3e8] sm:$0xff] }
 0x221   : > { %1236 = vmatpush.msrb.mxu1 %v1113_v59  ;;  %1185 = vmatpush.msra.mxu2 %v999_v56  ;;  %v1115_v58 = vld [vmem:[#allocation2 + $0x600] sm:$0xff]  ;;  %v930_v59 = vld [vmem:[#allocation2 + $0x38] sm:$0xff] }
 0x222   : > { %1279 = vmatpush.msrb.mxu3 %v948_v25  ;;  %1222 = vmatpush.msrb.mxu0 %v1069_v31  ;;  %v1055_v60 = vld [vmem:[#allocation2 + $0x420] sm:$0xff]  ;;  %v1042_v31 = vld [vmem:[#allocation2 + $0x3b8] sm:$0xff] }
 0x223   : > { %1237 = vmatpush.msrb.mxu1 %v1111_v61  ;;  %1186 = vmatpush.msra.mxu2 %v997_v5  ;;  %v1053_v61 = vld [vmem:[#allocation2 + $0x410] sm:$0xff]  ;;  %v1051_v52 = vld [vmem:[#allocation2 + $0x400] sm:$0xff]  ;;  %v986_v5 = vld [vmem:[#allocation2 + $0x1f8] sm:$0xff] }
 0x224   : > { %899 = vrot.lane.b32.xlu1 %v3773_v16, %s3224_s25  ;;  %1280 = vmatpush.msrb.mxu3 %v946_v18  ;;  %s3232_s25 = smov 95  }
 0x225   : > { %1238 = vmatpush.msrb.mxu1 %v1109_v54  ;;  %1187 = vmatpush.msra.mxu2 %v995_v14  ;;  %v924_v54 = vld [vmem:[#allocation2 + $0x8] sm:$0xff] }
 0x226   : > { %1281 = vmatpush.msrb.mxu3 %v944_v55  ;;  %1223 = vmatpush.msrb.mxu0 %v1067_v48  ;;  %v1014_v48 = vld [vmem:[#allocation2 + $0x2d8] sm:$0xff] }
 0x227   : > { %1239 = vmatpush.msrb.mxu1 %v1107_v4  ;;  %1188 = vmatpush.msra.mxu2 %v993_v26 }
 0x228   : > { %1282 = vmatpush.msrb.mxu3 %v942_v11  ;;  %1224 = vmatpush.msrb.mxu0 %v1065_v41  ;;  %v1016_v11 = vld [vmem:[#allocation2 + $0x2e8] sm:$0xff] }
 0x229   : > { %1240 = vmatpush.msrb.mxu1 %v1105_v62  ;;  %1189 = vmatpush.msra.mxu2 %v991_v57 }
 0x22a   : > { %1283 = vmatpush.msrb.mxu3 %v940_v43  ;;  %1225 = vmatpush.msrb.mxu0 %v1063_v12  ;;  %v1038_v43 = vld [vmem:[#allocation2 + $0x398] sm:$0xff]  ;;  %v1012_v12 = vld [vmem:[#allocation2 + $0x2c8] sm:$0xff] }
 0x22b   : > { %1241 = vmatpush.msrb.mxu1 %v1103_v40  ;;  %1190 = vmatpush.msra.mxu2 %v989_v23  ;;  %v978_v23 = vld [vmem:[#allocation2 + $0x1b8] sm:$0xff] }
 0x22c   : > { %1284 = vmatpush.msrb.mxu3 %v938_v53  ;;  %1226 = vmatpush.msrb.mxu0 %v1061_v8  ;;  %v972_v53 = vld [vmem:[#allocation2 + $0x188] sm:$0xff]  ;;  %v1010_v8 = vld [vmem:[#allocation2 + $0x2b8] sm:$0xff] }
 0x22d   : > { %1242 = vmatpush.msrb.mxu1 %v1101_v30  ;;  %1191 = vmatpush.msra.mxu2 %v987_v17  ;;  %v984_v30 = vld [vmem:[#allocation2 + $0x1e8] sm:$0xff] }
 0x22e   : > { %1285 = vmatpush.msrb.mxu3 %v936_v38  ;;  %1227 = vmatpush.msrb.mxu0 %v1059_v50  ;;  %v1008_v50 = vld [vmem:[#allocation2 + $0x2a8] sm:$0xff] }
 0x22f   : > { %1243 = vmatpush.msrb.mxu1 %v1099_v3  ;;  %2799 = vmatpush.msk.msrb.mxu2 %vm1129_vm8, %v1123_v39  ;;  %v1046_v3 = vld [vmem:[#allocation2 + $0x3d8] sm:$0xff] }
 0x230   : > { %1286 = vmatpush.msrb.mxu3 %v934_v46  ;;  %1228 = vmatpush.msrb.mxu0 %v1057_v47  ;;  %v974_v39 = vld [vmem:[#allocation2 + $0x198] sm:$0xff]  ;;  %v968_v46 = vld [vmem:[#allocation2 + $0x168] sm:$0xff] }
 0x231   : > { %1244 = vmatpush.msrb.mxu1 %v1097_v28  ;;  %1268 = vmatpush.msrb.mxu2 %v1121_v21  ;;  %v1030_v47 = vld [vmem:[#allocation2 + $0x358] sm:$0xff] }
 0x232   : > { %1287 = vmatpush.msrb.mxu3 %v932_v51  ;;  %1229 = vmatpush.msrb.mxu0 %v1055_v60  ;;  %v1006_v51 = vld [vmem:[#allocation2 + $0x298] sm:$0xff]  ;;  %v964_v60 = vld [vmem:[#allocation2 + $0x148] sm:$0xff] }
 0x233   : > { %1245 = vmatpush.msrb.mxu1 %v1095_v37  ;;  %1269 = vmatpush.msrb.mxu2 %v1119_v32  ;;  %v1018_v37 = vld [vmem:[#allocation2 + $0x2f8] sm:$0xff]  ;;  %v1076_v32 = vld [vmem:[#allocation2 + $0x4c8] sm:$0xff] }
 0x234   : > { %1288 = vmatpush.msrb.mxu3 %v930_v59  ;;  %1230 = vmatpush.msrb.mxu0 %v1053_v61  ;;  %v1070_v59 = vld [vmem:[#allocation2 + $0x498] sm:$0xff]  ;;  %v1028_v61 = vld [vmem:[#allocation2 + $0x348] sm:$0xff] }
 0x235   : > { %1246 = vmatpush.msrb.mxu1 %v1093_v35  ;;  %1270 = vmatpush.msrb.mxu2 %v1117_v45  ;;  %v1082_v35 = vld [vmem:[#allocation2 + $0x4f8] sm:$0xff] }
 0x236   : > { %1289 = vmatpush.msrb.mxu3 %v928_v36  ;;  %1231 = vmatpush.msrb.mxu0 %v1051_v52  ;;  %v1074_v45 = vld [vmem:[#allocation2 + $0x4b8] sm:$0xff]  ;;  %v1004_v36 = vld [vmem:[#allocation2 + $0x288] sm:$0xff] }
 0x237   : > { %1247 = vmatpush.msrb.mxu1 %v1091_v2  ;;  %1271 = vmatpush.msrb.mxu2 %v1115_v58  ;;  %v1072_v58 = vld [vmem:[#allocation2 + $0x4a8] sm:$0xff]  ;;  %v962_v52 = vld [vmem:[#allocation2 + $0x138] sm:$0xff] }
 0x238   : > { %1290 = vmatpush.msrb.mxu3 %v926_v0  ;;  %v1068_v0 = vld [vmem:[#allocation2 + $0x488] sm:$0xff] }
 0x239   : > { %1248 = vmatpush.msrb.mxu1 %v1089_v20  ;;  %v1078_v20 = vld [vmem:[#allocation2 + $0x4d8] sm:$0xff] }
 0x23a   : > { %1291 = vmatpush.msrb.mxu3 %v924_v54  ;;  %v1002_v54 = vld [vmem:[#allocation2 + $0x278] sm:$0xff] }
 0x23b   : > { %1249 = vmatpush.msrb.mxu1 %v1087_v19  ;;  %v1036_v19 = vld [vmem:[#allocation2 + $0x388] sm:$0xff] }
 0x23d   : > { %1250 = vmatpush.msrb.mxu1 %v1085_v24  ;;  %v1034_v24 = vld [vmem:[#allocation2 + $0x378] sm:$0xff] }
 0x23f   : > { %1251 = vmatpush.msrb.mxu1 %v1083_v33  ;;  %v1032_v33 = vld [vmem:[#allocation2 + $0x368] sm:$0xff] }
 0x274   : > { %v892_v63 = vpop.permute.xlu2 %891 }
 0x286   : > { %v3099_v4 = vpop.permute.xlu0 %3098 }
 0x287   : > { %v3101_v6 = vunpack.i.h.bf16 %v3099_v4  ;;  %v3100_v62 = vunpack.i.l.bf16 %v3099_v4  ;;  %v1026_v4 = vld [vmem:[#allocation2 + $0x338] sm:$0xff] }
 0x289   : > { %v904_v56 = vsel %vm518_vm2, %v892_v63, %v3100_v62  ;;  %v905_v10 = vsel %vm518_vm2, %v3100_v62, %v3101_v6  ;;  %v960_v62 = vld [vmem:[#allocation2 + $0x128] sm:$0xff] }
 0x28a   : > { %v3781_v40 = vmax.f32 %v3747_v29, %v904_v56  ;;  %v3784_v1 = vmax.f32 %v3728_v7, %v905_v10  ;;  %v980_v7 = vld [vmem:[#allocation2 + $0x1c8] sm:$0xff] }
 0x28b   : > { %v1024_v56 = vld [vmem:[#allocation2 + $0x328] sm:$0xff] }
 0x28c   : > { %1172 = vmatmul.f32.vlgmr.msra.gmra.mxu1 %v3781_v40  ;;  %1192 = vmatmul.f32.vlgmr.msra.gmra.mxu2 %v3784_v1  ;;  %v1064_v10 = vld [vmem:[#allocation2 + $0x468] sm:$0xff] }
 0x28d   : > { %1296 = vmatpush.msra.mxu2 %v986_v5  ;;  %1336 = vmatpush.msra.mxu1 %v1050_v49  ;;  %v958_v5 = vld [vmem:[#allocation2 + $0x118] sm:$0xff] }
 0x28e   : > { %v3104_v14 = vpop.permute.xlu1 %3103  ;;  %v902_v26 = vpop.permute.xlu0 %901  ;;  %v998_v49 = vld [vmem:[#allocation2 + $0x258] sm:$0xff] }
 0x28f   : > { %1297 = vmatpush.msra.mxu2 %v984_v30  ;;  %1337 = vmatpush.msra.mxu1 %v1048_v13  ;;  %v3106_v29 = vunpack.i.h.bf16 %v3104_v14  ;;  %v3105_v25 = vunpack.i.l.bf16 %v3104_v14  ;;  %v3795_v55 = vmax.f32 %v3759_v44, %v902_v26  ;;  %v1080_v44 = vld [vmem:[#allocation2 + $0x4e8] sm:$0xff]  ;;  %v1022_v30 = vld [vmem:[#allocation2 + $0x318] sm:$0xff] }
 0x290   : > { %v1062_v13 = vld [vmem:[#allocation2 + $0x458] sm:$0xff]  ;;  %v956_v14 = vld [vmem:[#allocation2 + $0x108] sm:$0xff] }
 0x291   : > { %1298 = vmatpush.msra.mxu2 %v982_v15  ;;  %1338 = vmatpush.msra.mxu1 %v1046_v3  ;;  %v903_v28 = vsel %vm518_vm2, %v3106_v29, %v892_v63  ;;  %v906_v18 = vsel %vm518_vm2, %v3101_v6, %v3105_v25  ;;  %v1066_v6 = vld [vmem:[#allocation2 + $0x478] sm:$0xff]  ;;  %v1000_v63 = vld [vmem:[#allocation2 + $0x268] sm:$0xff] }
 0x292   : > { %v916_v57 = vmax.f32 %v3751_v34, %v903_v28  ;;  %v3792_v22 = vmax.f32 %v3732_v9, %v906_v18  ;;  %v976_v9 = vld [vmem:[#allocation2 + $0x1a8] sm:$0xff] }
 0x293   : > { %1299 = vmatpush.msra.mxu2 %v980_v7  ;;  %1339 = vmatpush.msra.mxu1 %v1044_v27  ;;  %v1040_v34 = vld [vmem:[#allocation2 + $0x3a8] sm:$0xff]  ;;  %v1058_v7 = vld [vmem:[#allocation2 + $0x438] sm:$0xff] }
 0x294   : > { %1152 = vmatmul.f32.vlgmr.msra.gmra.mxu0 %v916_v57  ;;  %1212 = vmatmul.f32.vlgmr.msra.gmra.mxu3 %v3792_v22  ;;  %v996_v15 = vld [vmem:[#allocation2 + $0x248] sm:$0xff] }
 0x295   : > { %2800 = vmatmul.msk.f32.vlgmr.msrb.gmra.mxu2 %vm1125_vm9, %v3795_v55  ;;  %1316 = vmatpush.msra.mxu0 %v1018_v37  ;;  %v1020_v3 = vld [vmem:[#allocation2 + $0x308] sm:$0xff]  ;;  %v990_v37 = vld [vmem:[#allocation2 + $0x218] sm:$0xff] }
 0x296   : > { %1300 = vmatpush.msra.mxu2 %v978_v23  ;;  %1340 = vmatpush.msra.mxu1 %v1042_v31  ;;  %v900_v17 = vpop.permute.xlu1 %899  ;;  %v1060_v29 = vld [vmem:[#allocation2 + $0x448] sm:$0xff]  ;;  %v1054_v23 = vld [vmem:[#allocation2 + $0x418] sm:$0xff] }
 0x297   : > { %1356 = vmatpush.msra.mxu3 %v1082_v35  ;;  %v908_v2 = vsel %vm518_vm2, %v900_v17, %v902_v26  ;;  %1317 = vmatpush.msra.mxu0 %v1016_v11  ;;  %v907_v21 = vsel %vm518_vm2, %v3105_v25, %v900_v17  ;;  %v1114_v25 = vld [vmem:[#allocation2 + $0x5f8] sm:$0xff]  ;;  %v1112_v27 = vld [vmem:[#allocation2 + $0x5e8] sm:$0xff]  ;;  %vm2169_vm2 = vcmask 1040384  }
 0x298   : > { %1301 = vmatpush.msra.mxu2 %v976_v9  ;;  %1341 = vmatpush.msra.mxu1 %v1040_v34  ;;  %v3802_v41 = vmax.f32 %v3773_v16, %v908_v2  ;;  %v3807_v38 = vmax.f32 %v3755_v42, %v907_v21  ;;  %v970_v16 = vld [vmem:[#allocation2 + $0x178] sm:$0xff]  ;;  %v992_v28 = vld [vmem:[#allocation2 + $0x228] sm:$0xff] }
 0x299   : > { %1357 = vmatpush.msra.mxu3 %v1080_v44  ;;  %1318 = vmatpush.msra.mxu0 %v1014_v48  ;;  %v966_v42 = vld [vmem:[#allocation2 + $0x158] sm:$0xff]  ;;  %v1056_v18 = vld [vmem:[#allocation2 + $0x428] sm:$0xff] }
 0x29a   : > { %1302 = vmatpush.msra.mxu2 %v974_v39  ;;  %1342 = vmatpush.msra.mxu1 %v1038_v43  ;;  %v994_v26 = vld [vmem:[#allocation2 + $0x238] sm:$0xff]  ;;  %v1108_v31 = vld [vmem:[#allocation2 + $0x5c8] sm:$0xff] }
 0x29b   : > { %1358 = vmatpush.msra.mxu3 %v1078_v20  ;;  %1252 = vmatmul.f32.vlgmr.msrb.gmra.mxu1 %v3802_v41  ;;  %v988_v35 = vld [vmem:[#allocation2 + $0x208] sm:$0xff]  ;;  %v1122_v34 = vld [vmem:[#allocation2 + $0x638] sm:$0xff] }
 0x29c   : > { %1303 = vmatpush.msra.mxu2 %v972_v53  ;;  %1319 = vmatpush.msra.mxu0 %v1012_v12  ;;  %v1052_v11 = vld [vmem:[#allocation2 + $0x408] sm:$0xff]  ;;  %v1102_v17 = vld [vmem:[#allocation2 + $0x598] sm:$0xff] }
 0x29d   : > { %1343 = vmatpush.msra.mxu1 %v1036_v19  ;;  %1359 = vmatpush.msra.mxu3 %v1076_v32  ;;  %v1104_v9 = vld [vmem:[#allocation2 + $0x5a8] sm:$0xff]  ;;  %v1118_v2 = vld [vmem:[#allocation2 + $0x618] sm:$0xff] }
 0x29e   : > { %1232 = vmatmul.f32.vlgmr.msrb.gmra.mxu0 %v3807_v38  ;;  %1292 = vmatmul.f32.vlgmr.msrb.gmra.mxu3 %v916_v57  ;;  %v1110_v57 = vld [vmem:[#allocation2 + $0x5d8] sm:$0xff]  ;;  %v1120_v44 = vld [vmem:[#allocation2 + $0x628] sm:$0xff] }
 0x29f   : > { %1304 = vmatpush.msra.mxu2 %v970_v16  ;;  %1320 = vmatpush.msra.mxu0 %v1010_v8  ;;  %v1100_v48 = vld [vmem:[#allocation2 + $0x588] sm:$0xff]  ;;  %v1098_v39 = vld [vmem:[#allocation2 + $0x578] sm:$0xff] }
 0x2a0   : > { %1344 = vmatpush.msra.mxu1 %v1034_v24  ;;  %1360 = vmatpush.msra.mxu3 %v1074_v45  ;;  %v1116_v43 = vld [vmem:[#allocation2 + $0x608] sm:$0xff]  ;;  %v1094_v20 = vld [vmem:[#allocation2 + $0x558] sm:$0xff] }
 0x2a1   : > { %1305 = vmatpush.msra.mxu2 %v968_v46  ;;  %1321 = vmatpush.msra.mxu0 %v1008_v50  ;;  %v1092_v21 = vld [vmem:[#allocation2 + $0x548] sm:$0xff]  ;;  %v1090_v53 = vld [vmem:[#allocation2 + $0x538] sm:$0xff] }
 0x2a2   : > { %1345 = vmatpush.msra.mxu1 %v1032_v33  ;;  %1361 = vmatpush.msra.mxu3 %v1072_v58  ;;  %v1088_v12 = vld [vmem:[#allocation2 + $0x528] sm:$0xff]  ;;  %v1086_v19 = vld [vmem:[#allocation2 + $0x518] sm:$0xff] }
 0x2a3   : > { %1306 = vmatpush.msra.mxu2 %v966_v42  ;;  %1322 = vmatpush.msra.mxu0 %v1006_v51  ;;  %v1084_v32 = vld [vmem:[#allocation2 + $0x508] sm:$0xff] }
 0x2a4   : > { %1346 = vmatpush.msra.mxu1 %v1030_v47  ;;  %1362 = vmatpush.msra.mxu3 %v1070_v59 }
 0x2a5   : > { %1307 = vmatpush.msra.mxu2 %v964_v60  ;;  %1323 = vmatpush.msra.mxu0 %v1004_v36 }
 0x2a6   : > { %1347 = vmatpush.msra.mxu1 %v1028_v61  ;;  %1363 = vmatpush.msra.mxu3 %v1068_v0 }
 0x2a7   : > { %1308 = vmatpush.msra.mxu2 %v962_v52  ;;  %1324 = vmatpush.msra.mxu0 %v1002_v54 }
 0x2a8   : > { %1348 = vmatpush.msra.mxu1 %v1026_v4  ;;  %1364 = vmatpush.msra.mxu3 %v1066_v6 }
 0x2a9   : > { %1309 = vmatpush.msra.mxu2 %v960_v62  ;;  %1325 = vmatpush.msra.mxu0 %v1000_v63 }
 0x2aa   : > { %1349 = vmatpush.msra.mxu1 %v1024_v56  ;;  %1365 = vmatpush.msra.mxu3 %v1064_v10 }
 0x2ab   : > { %1310 = vmatpush.msra.mxu2 %v958_v5  ;;  %1326 = vmatpush.msra.mxu0 %v998_v49  ;;  %v2003_v5 = vld [vmem:[%s4445_s5 + $0x8] sm:$0xff]  ;;  %v2002_v49 = vld [vmem:[%s4445_s5] sm:$0xff] }
 0x2ac   : > { %1350 = vmatpush.msra.mxu1 %v1022_v30  ;;  %1366 = vmatpush.msra.mxu3 %v1062_v13  ;;  %v1416_v30 = vld [vmem:[%s4444_s4] sm:$0xff]  ;;  %v1417_v13 = vld [vmem:[%s4444_s4 + $0x8] sm:$0xff] }
 0x2ad   : > { %1311 = vmatpush.msra.mxu2 %v956_v14  ;;  %1327 = vmatpush.msra.mxu0 %v996_v15 }
 0x2ae   : > { %1351 = vmatpush.msra.mxu1 %v1020_v3  ;;  %1367 = vmatpush.msra.mxu3 %v1060_v29 }
 0x2af   : > { %1312 = vmatmul.f32.vlgmr.msra.gmra.mxu2 %v3781_v40  ;;  %1352 = vmatmul.f32.vlgmr.msra.gmra.mxu1 %v3792_v22  ;;  %v1106_v40 = vld [vmem:[#allocation2 + $0x5b8] sm:$0xff]  ;;  %v1124_v22 = vld [vmem:[#allocation2 + $0x648] sm:$0x7f] }
 0x2b0   : > { %1376 = vmatpush.msrb.mxu2 %v1114_v25  ;;  %1328 = vmatpush.msra.mxu0 %v994_v26  ;;  %v2804_v25 = vld [vmem:[%s4444_s4 + $0x18] sm:$0xff] }
 0x2b1   : > { %1368 = vmatpush.msra.mxu3 %v1058_v7  ;;  %v2803_v7 = vld [vmem:[%s4444_s4 + $0x10] sm:$0xff] }
 0x2b2   : > { %1377 = vmatpush.msrb.mxu2 %v1112_v27  ;;  %1329 = vmatpush.msra.mxu0 %v992_v28 }
 0x2b3   : > { %1369 = vmatpush.msra.mxu3 %v1056_v18  ;;  %v2819_v18 = vld [vmem:[%s4444_s4 + $0x30] sm:$0xff] }
 0x2b4   : > { %1378 = vmatpush.msrb.mxu2 %v1110_v57  ;;  %1330 = vmatpush.msra.mxu0 %v990_v37  ;;  %v2820_v37 = vld [vmem:[%s4444_s4 + $0x38] sm:$0xff] }
 0x2b5   : > { %1370 = vmatpush.msra.mxu3 %v1054_v23 }
 0x2b6   : > { %1379 = vmatpush.msrb.mxu2 %v1108_v31  ;;  %1331 = vmatpush.msra.mxu0 %v988_v35  ;;  %v2813_v31 = vld [vmem:[%s4444_s4 + $0x20] sm:$0xff] }
 0x2b7   : > { %1371 = vmatpush.msra.mxu3 %v1052_v11  ;;  %1332 = vmatmul.f32.vlgmr.msra.gmra.mxu0 %v3784_v1  ;;  %v1096_v1 = vld [vmem:[#allocation2 + $0x568] sm:$0xff] }
 0x2b8   : > { %1372 = vmatmul.f32.vlgmr.msra.gmra.mxu3 %v3807_v38  ;;  %1380 = vmatpush.msrb.mxu2 %v1106_v40 }
 0x2b9   : > { %2801 = vmatpush.msk.msrb.mxu0 %vm1129_vm8, %v1124_v22 }
 0x2ba   : > { %1381 = vmatpush.msrb.mxu2 %v1104_v9  ;;  %v2814_v9 = vld [vmem:[%s4444_s4 + $0x28] sm:$0xff] }
 0x2bb   : > { %1408 = vmatpush.msrb.mxu0 %v1122_v34 }
 0x2bc   : > { %1382 = vmatpush.msrb.mxu2 %v1102_v17 }
 0x2bd   : > { %1409 = vmatpush.msrb.mxu0 %v1120_v44 }
 0x2be   : > { %1383 = vmatpush.msrb.mxu2 %v1100_v48 }
 0x2bf   : > { %1410 = vmatpush.msrb.mxu0 %v1118_v2  ;;  %v2825_v2 = vld [vmem:[%s4444_s4 + $0x40] sm:$0xff] }
 0x2c0   : > { %1384 = vmatpush.msrb.mxu2 %v1098_v39  ;;  %v2831_v39 = vld [vmem:[%s4444_s4 + $0x50] sm:$0xff] }
 0x2c1   : > { %1411 = vmatpush.msrb.mxu0 %v1116_v43 }
 0x2c2   : > { %2802 = vmatmul.msk.f32.vlgmr.msrb.gmra.mxu0 %vm1125_vm9, %v3795_v55  ;;  %1385 = vmatpush.msrb.mxu2 %v1096_v1 }
 0x2c4   : > { %1386 = vmatpush.msrb.mxu2 %v1094_v20 }
 0x2c6   : > { %1387 = vmatpush.msrb.mxu2 %v1092_v21 }
 0x2c8   : > { %1388 = vmatpush.msrb.mxu2 %v1090_v53  ;;  %v2826_v53 = vld [vmem:[%s4444_s4 + $0x48] sm:$0xff] }
 0x2ca   : > { %1389 = vmatpush.msrb.mxu2 %v1088_v12  ;;  %v2832_v12 = vld [vmem:[%s4444_s4 + $0x58] sm:$0xff] }
 0x2cc   : > { %1390 = vmatpush.msrb.mxu2 %v1086_v19 }
 0x2ce   : > { %1391 = vmatpush.msrb.mxu2 %v1084_v32 }
 0x2cf   : > { %1392 = vmatmul.f32.vlgmr.msrb.gmra.mxu2 %v3802_v41 }
 0x309   : > { %v1173_v38 = vpop.f32.mrf.mxu1 }
 0x30f   : > { %v1193_v24 = vpop.f32.mrf.mxu2 }
 0x311   : > { %v1153_v16 = vpop.f32.mrf.mxu0 }
 0x312   : > { %v1174_v8 = vadd.f32 %v1173_v38, %v1153_v16  ;;  %v2837_v16 = vld [vmem:[%s4444_s4 + $0x60] sm:$0xff] }
 0x314   : > { %v1194_v45 = vadd.f32 %v1193_v24, %v1174_v8  ;;  %v2843_v8 = vld [vmem:[%s4444_s4 + $0x70] sm:$0xff] }
 0x317   : > { %v1213_v55 = vpop.f32.mrf.mxu3 }
 0x318   : > { %v1214_v46 = vadd.f32 %v1213_v55, %v1194_v45  ;;  %v1253_v58 = vpop.f32.mrf.mxu1  ;;  %v1273_v51 = vpop.f32.mrf.mxu2  ;;  %v2838_v45 = vld [vmem:[%s4444_s4 + $0x68] sm:$0xff]  ;;  %v2844_v55 = vld [vmem:[%s4444_s4 + $0x78] sm:$0xff] }
 0x31b   : > { %v1233_v50 = vpop.f32.mrf.mxu0 }
 0x31c   : > { %v1234_v33 = vadd.f32 %v1233_v50, %v1214_v46  ;;  %v2849_v46 = vld [vmem:[%s4444_s4 + $0x80] sm:$0xff]  ;;  %v2850_v50 = vld [vmem:[%s4444_s4 + $0x88] sm:$0xff] }
 0x31e   : > { %v1254_v42 = vadd.f32 %v1253_v58, %v1234_v33 }
 0x320   : > { %v1274_v47 = vadd.f32 %v1273_v51, %v1254_v42 }
 0x321   : > { %v1293_v59 = vpop.f32.mrf.mxu3 }
 0x322   : > { %1538 = vrot.lane.b32.xlu1 %v1274_v47, %s3223_s24  ;;  %1504 = vmatpush.msra.mxu0 %v1274_v47 }
 0x323   : > { %2809 = vmatmul.msk.f32.vlgmr.msra.gmra.mxu0 %vm1430_vm10, %v1416_v30 }
 0x32a   : > { %1604 = vrot.lane.b32.xlu1 %v1274_v47, %s4450_s21 }
 0x32b   : > { %2810 = vmatmul.msk.f32.gmra.mxu0 %vm1430_vm10, %v1417_v13 }
 0x32c   : > { %v1353_v0 = vpop.f32.mrf.mxu1 }
 0x332   : > { %v1313_v41 = vpop.f32.mrf.mxu2 }
 0x333   : > { %v1314_v60 = vadd.f32 %v1313_v41, %v1293_v59 }
 0x334   : > { %v1333_v36 = vpop.f32.mrf.mxu0 }
 0x335   : > { %v1334_v61 = vadd.f32 %v1333_v36, %v1314_v60 }
 0x337   : > { %v1354_v54 = vadd.f32 %v1353_v0, %v1334_v61 }
 0x33b   : > { %v1373_v52 = vpop.f32.mrf.mxu3 }
 0x33c   : > { %v1374_v4 = vadd.f32 %v1373_v52, %v1354_v54 }
 0x33f   : > { %v1413_v63 = vpop.f32.mrf.mxu0 }
 0x352   : > { %v1393_v6 = vpop.f32.mrf.mxu2 }
 0x353   : > { %v1394_v62 = vadd.f32 %v1393_v6, %v1374_v4 }
 0x355   : > { %v1414_v56 = vadd.f32 %v1413_v63, %v1394_v62 }
 0x357   : > { %1540 = vrot.lane.b32.xlu0 %v1414_v56, %s3223_s24  ;;  %1527 = vmatpush.msra.mxu2 %v1414_v56  ;;  %v3107_v10 = vpack.i.bf16 %v1414_v56, %v1274_v47 }
 0x358   : > { %1807 = vrot.lane.b32.xlu1 %v1414_v56, %s3226_s27  ;;  %2811 = vmatmul.msk.f32.vlgmr.msra.gmra.mxu2 %vm1430_vm10, %v1416_v30 }
 0x359   : > { %3108 = vrot.lane.b32.xlu2 %v3107_v10, %s3222_s23 }
 0x35f   : > { %1673 = vrot.lane.b32.xlu0 %v1414_v56, %s3231_s22 }
 0x360   : > { %1873 = vrot.lane.b32.xlu1 %v1414_v56, %s3232_s25  ;;  %2812 = vmatmul.msk.f32.gmra.mxu2 %vm1430_vm10, %v1417_v13 }
 0x361   : > { %1606 = vrot.lane.b32.xlu2 %v1414_v56, %s4450_s21  ;;  %s3162_s21 = scalar_lea.hbm %s4449_s9, 2 }
 0x367   : > { %1740 = vrot.lane.b32.xlu0 %v1414_v56, %s3233_s26 }
 0x368   : > { %1938 = vrot.lane.b32.xlu1 %v1274_v47, %s3234_s28 }
 0x369   : > { %1671 = vrot.lane.b32.xlu2 %v1274_v47, %s3231_s22 }
 0x36f   : > { %1805 = vrot.lane.b32.xlu0 %v1274_v47, %s3226_s27 }
 0x371   : > { %1738 = vrot.lane.b32.xlu2 %v1274_v47, %s3233_s26 }
 0x377   : > { %1871 = vrot.lane.b32.xlu0 %v1274_v47, %s3232_s25  ;;  %s338_s25 = sand.u32 1, %s3200_s10  }
 0x378   : > { %s339_s14 = scalar_lea.vmem [#allocation5], %s338_s25 }
 0x379   : > { %1940 = vrot.lane.b32.xlu2 %v1414_v56, %s3234_s28  ;;  %s2721_s28 = scalar_lea.hbm %s4449_s9, %s3306_s13 }
 0x37a   : > { %s2725_s16 = sshll.u32 %s2721_s28, 4  ;;  %s2726_s16 = int_to_ptr.hbm [resolvable:$true] %s2725_s16 }
 0x37b   : > { %s3156_s27 = sshra.s32 %s2726_s16, 4  ;;  %s3157_s27 = int_to_ptr.hbm [resolvable:$true] %s3156_s27 }
 0x37c   : > { %s3158_s13 = scalar_lea.hbm %s3157_s27, 1  ;;  %p3163_p3 = scmp.lt.s32.totalorder %s3157_s27, %s4449_s9 }
 0x37d   : > { %p3159_p0 = scmp.ne.s32.totalorder %s3157_s27, %s3158_s13  ;;  %p3164_p4 = scmp.lt.s32.totalorder %s3162_s21, %s3158_s13 }
 0x37f   : > { %2011 = vperm.xlu0 %3080, %v2003_v5   ;;  %p3160_p1 = pnand %p3159_p0, %p3323_p5  ;;  %p3165_p7 = por %p3164_p4, %p3163_p3 }
 0x381   : > { %2006 = vperm.xlu2 %3081, %v2002_v49   ;;  %p3161_p2 = pneg %p3160_p1 }
 0x383   : > { %p3166_p8 = pnand %p3165_p7, %p3161_p2 }
 0x394   : > { %v1539_v14 = vpop.permute.xlu1 %1538 }
 0x39c   : > { %v1605_v27 = vpop.permute.xlu1 %1604 }
 0x3a0   : > { %v1506_v58 = vpop.f32.mrf.mxu0 }
 0x3a8   : > { %v1509_v41 = vpop.f32.mrf.mxu0 }
 0x3b3   : > { %v3109_v15 = vpop.permute.xlu2 %3108 }
 0x3b4   : > { %v3111_v3 = vunpack.i.h.bf16 %v3109_v15  ;;  %v3110_v29 = vunpack.i.l.bf16 %v3109_v15 }
 0x3b6   : > { %v1427_v26 = vsel %vm412_vm0, %v3110_v29, %v3111_v3 }
 0x3b7   : > { %1452 = vmatpush.msrb.mxu1 %v1427_v26  ;;  %2997 = vmatpush.msrb.mxu3 %v1427_v26 }
 0x3b8   : > { %2806 = vmatmul.msk.f32.vlgmr.msrb.gmra.mxu3 %vm1430_vm10, %v2804_v25  ;;  %2805 = vmatmul.msk.f32.vlgmr.msrb.gmra.mxu1 %vm1430_vm10, %v2803_v7 }
 0x3b9   : > { %1475 = vmatpush.msra.mxu3 %v3111_v3 }
 0x3bb   : > { %v1607_v28 = vpop.permute.xlu2 %1606 }
 0x3bc   : > { %v1609_v57 = vsel %vm1608_vm11, %v1605_v27, %v1607_v28  ;;  %1656 = vmatpush.msrb.mxu2 %v1607_v28 }
 0x3bd   : > { %1633 = vmatpush.msrb.mxu0 %v1609_v57  ;;  %2823 = vmatmul.msk.f32.vlgmr.msrb.gmra.mxu2 %vm1430_vm10, %v2819_v18 }
 0x3be   : > { %2821 = vmatmul.msk.f32.vlgmr.msrb.gmra.mxu0 %vm1430_vm10, %v2819_v18 }
 0x3c0   : > { %2807 = vmatmul.msk.f32.vlgmr.msra.gmra.mxu3 %vm1430_vm10, %v2803_v7 }
 0x3c3   : > { %v1672_v11 = vpop.permute.xlu2 %1671 }
 0x3c5   : > { %2824 = vmatmul.msk.f32.gmra.mxu2 %vm1430_vm10, %v2820_v37 }
 0x3c6   : > { %2822 = vmatmul.msk.f32.gmra.mxu0 %vm1430_vm10, %v2820_v37 }
 0x3c8   : > { %2808 = vmatmul.msk.f32.gmra.mxu3 %vm1430_vm10, %v2804_v25 }
 0x3c9   : > { %v1541_v23 = vpop.permute.xlu0 %1540 }
 0x3ca   : > { %v1542_v35 = vsel %vm465_vm1, %v1539_v14, %v1541_v23  ;;  %1589 = vmatpush.msrb.mxu3 %v1541_v23  ;;  %v1808_v40 = vpop.permute.xlu1 %1807  ;;  %vm2099_vm1 = vcmask 1044480  }
 0x3cb   : > { %1566 = vmatpush.msra.mxu1 %v1542_v35  ;;  %v1739_v17 = vpop.permute.xlu2 %1738 }
 0x3cc   : > { %2815 = vmatmul.msk.f32.vlgmr.msra.gmra.mxu1 %vm1430_vm10, %v2813_v31 }
 0x3d0   : > { %2817 = vmatmul.msk.f32.vlgmr.msrb.gmra.mxu3 %vm1430_vm10, %v2813_v31 }
 0x3d1   : > { %v1674_v22 = vpop.permute.xlu0 %1673 }
 0x3d2   : > { %v1676_v34 = vsel %vm1675_vm12, %v1672_v11, %v1674_v22  ;;  %1723 = vmatpush.msra.mxu3 %v1674_v22  ;;  %v1874_v44 = vpop.permute.xlu1 %1873 }
 0x3d3   : > { %1700 = vmatpush.msrb.mxu1 %v1676_v34  ;;  %v1941_v1 = vpop.permute.xlu2 %1940 }
 0x3d4   : > { %1856 = vmatpush.msrb.mxu3 %v1808_v40  ;;  %2816 = vmatmul.msk.f32.gmra.mxu1 %vm1430_vm10, %v2814_v9 }
 0x3d8   : > { %2818 = vmatmul.msk.f32.gmra.mxu3 %vm1430_vm10, %v2814_v9 }
 0x3d9   : > { %v1741_v48 = vpop.permute.xlu0 %1740 }
 0x3da   : > { %v1743_v43 = vsel %vm1742_vm13, %v1739_v17, %v1741_v48  ;;  %1790 = vmatpush.msra.mxu2 %v1741_v48  ;;  %v1939_v20 = vpop.permute.xlu1 %1938 }
 0x3db   : > { %1767 = vmatpush.msra.mxu0 %v1743_v43  ;;  %2835 = vmatmul.msk.f32.vlgmr.msra.gmra.mxu2 %vm1430_vm10, %v2831_v39  ;;  %v1943_v32 = vsel %vm1942_vm14, %v1939_v20, %v1941_v1  ;;  %v1529_v47 = vpop.f32.mrf.mxu2 }
 0x3dc   : > { %1923 = vmatpush.msrb.mxu2 %v1874_v44  ;;  %2827 = vmatmul.msk.f32.vlgmr.msrb.gmra.mxu1 %vm1430_vm10, %v2825_v2 }
 0x3dd   : > { %2833 = vmatmul.msk.f32.vlgmr.msra.gmra.mxu0 %vm1430_vm10, %v2831_v39 }
 0x3e0   : > { %2829 = vmatmul.msk.f32.vlgmr.msra.gmra.mxu3 %vm1430_vm10, %v2825_v2  ;;  %v2007_v2 = vpop.permute.xlu2 %2006 }
 0x3e1   : > { %1990 = vmatpush.msra.mxu3 %v1941_v1  ;;  %v1806_v21 = vpop.permute.xlu0 %1805 }
 0x3e2   : > { %v1809_v19 = vsel %vm624_vm4, %v1806_v21, %v1808_v40  ;;  %vm2710_vm4 = vcmask 73728  }
 0x3e3   : > { %1833 = vmatpush.msra.mxu1 %v1809_v19  ;;  %2836 = vmatmul.msk.f32.gmra.mxu2 %vm1430_vm10, %v2832_v12  ;;  %v1532_v36 = vpop.f32.mrf.mxu2 }
 0x3e4   : > { %2828 = vmatmul.msk.f32.gmra.mxu1 %vm1430_vm10, %v2826_v53 }
 0x3e5   : > { %2834 = vmatmul.msk.f32.gmra.mxu0 %vm1430_vm10, %v2832_v12  ;;  %1967 = vmatpush.msrb.mxu1 %v1943_v32 }
 0x3e8   : > { %2830 = vmatmul.msk.f32.gmra.mxu3 %vm1430_vm10, %v2826_v53 }
 0x3e9   : > { %v1872_v38 = vpop.permute.xlu0 %1871 }
 0x3ea   : > { %v1876_v24 = vsel %vm1875_vm15, %v1872_v38, %v1874_v44 }
 0x3eb   : > { %1900 = vmatpush.msrb.mxu0 %v1876_v24  ;;  %2847 = vmatmul.msk.f32.vlgmr.msrb.gmra.mxu2 %vm1430_vm10, %v2843_v8 }
 0x3ec   : > { %2839 = vmatmul.msk.f32.vlgmr.msra.gmra.mxu1 %vm1430_vm10, %v2837_v16 }
 0x3ed   : > { %2845 = vmatmul.msk.f32.vlgmr.msrb.gmra.mxu0 %vm1430_vm10, %v2843_v8 }
 0x3f0   : > { %2841 = vmatmul.msk.f32.vlgmr.msrb.gmra.mxu3 %vm1430_vm10, %v2837_v16 }
 0x3f3   : > { %2848 = vmatmul.msk.f32.gmra.mxu2 %vm1430_vm10, %v2844_v55 }
 0x3f4   : > { %2840 = vmatmul.msk.f32.gmra.mxu1 %vm1430_vm10, %v2838_v45 }
 0x3f5   : > { %2846 = vmatmul.msk.f32.gmra.mxu0 %vm1430_vm10, %v2844_v55 }
 0x3f8   : > { %2842 = vmatmul.msk.f32.gmra.mxu3 %vm1430_vm10, %v2838_v45 }
 0x3fc   : > { %2851 = vmatmul.msk.f32.vlgmr.msrb.gmra.mxu1 %vm1430_vm10, %v2849_v46 }
 0x400   : > { %2853 = vmatmul.msk.f32.vlgmr.msra.gmra.mxu3 %vm1430_vm10, %v2849_v46 }
 0x404   : > { %2852 = vmatmul.msk.f32.gmra.mxu1 %vm1430_vm10, %v2850_v50 }
 0x408   : > { %2854 = vmatmul.msk.f32.gmra.mxu3 %vm1430_vm10, %v2850_v50 }
 0x435   : > { %v1454_v42 = vpop.f32.mrf.mxu1 }
 0x436   : > { %v1507_v56 = vadd.f32 %v1506_v58, %v1454_v42 }
 0x43b   : > { %v1457_v33 = vpop.f32.mrf.mxu3  ;;  %v1635_v61 = vpop.f32.mrf.mxu0 }
 0x43c   : > { %v1510_v37 = vadd.f32 %v1509_v41, %v1457_v33 }
 0x440   : > { %v1658_v54 = vpop.f32.mrf.mxu2 }
 0x443   : > { %v1477_v51 = vpop.f32.mrf.mxu3  ;;  %v1638_v4 = vpop.f32.mrf.mxu0 }
 0x444   : > { %v1530_v26 = vadd.f32 %v1529_v47, %v1477_v51 }
 0x448   : > { %v1661_v63 = vpop.f32.mrf.mxu2 }
 0x449   : > { %v1568_v59 = vpop.f32.mrf.mxu1 }
 0x44a   : > { %v1597_v30 = vadd.f32 %v1568_v59, %v1507_v56  ;;  %v2081_v56 = vld [vmem:[%s4446_s6 + $0x78] sm:$0xff] }
 0x44b   : > { %v1480_v60 = vpop.f32.mrf.mxu3  ;;  %2103 = vmatpush.msra.mxu0 %v2081_v56  ;;  %v2879_v56 = vld [vmem:[%s4447_s7 + $0xb0] sm:$0xff] }
 0x44c   : > { %v1664_v13 = vadd.f32 %v1635_v61, %v1597_v30  ;;  %v1533_v40 = vadd.f32 %v1532_v36, %v1480_v60  ;;  %v2012_v60 = vpop.permute.xlu0 %2011  ;;  %v2086_v30 = vld [vmem:[%s4446_s6 + $0xa0] sm:$0xff] }
 0x451   : > { %v1571_v0 = vpop.f32.mrf.mxu1 }
 0x452   : > { %v1599_v31 = vadd.f32 %v1571_v0, %v1510_v37 }
 0x453   : > { %v1591_v52 = vpop.f32.mrf.mxu3 }
 0x454   : > { %v1598_v28 = vadd.f32 %v1591_v52, %v1530_v26  ;;  %v1666_v17 = vadd.f32 %v1638_v4, %v1599_v31  ;;  %v2082_v31 = vld [vmem:[%s4446_s6 + $0x80] sm:$0xff] }
 0x456   : > { %v1665_v35 = vadd.f32 %v1658_v54, %v1598_v28 }
 0x459   : > { %v1702_v6 = vpop.f32.mrf.mxu1 }
 0x45a   : > { %v1769_v5 = vpop.f32.mrf.mxu0  ;;  %v1731_v29 = vadd.f32 %v1702_v6, %v1664_v13  ;;  %v2091_v6 = vld [vmem:[%s4446_s6 + $0xc8] sm:$0x1f]  ;;  %v2085_v13 = vld [vmem:[%s4446_s6 + $0x98] sm:$0xff] }
 0x45b   : > { %v1594_v62 = vpop.f32.mrf.mxu3  ;;  %2855 = vmatpush.msk.msra.mxu2 %vm2099_vm1, %v2091_v6  ;;  %v2859_v6 = vld [vmem:[%s4447_s7 + $0x40] sm:$0xff] }
 0x45c   : > { %v1798_v7 = vadd.f32 %v1769_v5, %v1731_v29  ;;  %v1600_v44 = vadd.f32 %v1594_v62, %v1533_v40  ;;  %v2090_v62 = vld [vmem:[%s4446_s6 + $0xc0] sm:$0xff]  ;;  %v2088_v5 = vld [vmem:[%s4446_s6 + $0xb0] sm:$0xff] }
 0x45d   : > { %2133 = vmatpush.msra.mxu2 %v2090_v62  ;;  %v2076_v40 = vld [vmem:[%s4446_s6 + $0x50] sm:$0xff]  ;;  %v2149_v62 = vld [vmem:[%s4447_s7] sm:$0xff] }
 0x45e   : > { %v1792_v14 = vpop.f32.mrf.mxu2  ;;  %v1667_v53 = vadd.f32 %v1661_v63, %v1600_v44  ;;  %v2089_v63 = vld [vmem:[%s4446_s6 + $0xb8] sm:$0xff]  ;;  %v2071_v44 = vld [vmem:[%s4446_s6 + $0x28] sm:$0xff] }
 0x45f   : > { %2134 = vmatpush.msra.mxu2 %v2089_v63  ;;  %v2900_v63 = vld [vmem:[%s4447_s7 + $0x138] sm:$0xff] }
 0x461   : > { %v1705_v10 = vpop.f32.mrf.mxu1  ;;  %2135 = vmatpush.msra.mxu2 %v2088_v5  ;;  %v2858_v5 = vld [vmem:[%s4447_s7 + $0x38] sm:$0xff] }
 0x462   : > { %v1772_v25 = vpop.f32.mrf.mxu0  ;;  %v1733_v43 = vadd.f32 %v1705_v10, %v1666_v17  ;;  %v2080_v10 = vld [vmem:[%s4446_s6 + $0x70] sm:$0xff] }
 0x463   : > { %v1725_v49 = vpop.f32.mrf.mxu3  ;;  %2104 = vmatpush.msra.mxu0 %v2080_v10  ;;  %v2072_v17 = vld [vmem:[%s4446_s6 + $0x30] sm:$0xff] }
 0x464   : > { %v1732_v22 = vadd.f32 %v1725_v49, %v1665_v35  ;;  %v1800_v32 = vadd.f32 %v1772_v25, %v1733_v43  ;;  %v2087_v49 = vld [vmem:[%s4446_s6 + $0xa8] sm:$0xff]  ;;  %v2078_v35 = vld [vmem:[%s4446_s6 + $0x60] sm:$0xff]  ;;  %v2893_v10 = vld [vmem:[%s4447_s7 + $0x110] sm:$0x1] }
 0x465   : > { %2136 = vmatpush.msra.mxu2 %v2087_v49  ;;  %v2067_v43 = vld [vmem:[%s4446_s6 + $0x8] sm:$0xff]  ;;  %v2899_v49 = vld [vmem:[%s4447_s7 + $0x130] sm:$0xff] }
 0x466   : > { %v1795_v18 = vpop.f32.mrf.mxu2  ;;  %v1799_v1 = vadd.f32 %v1792_v14, %v1732_v22  ;;  %v2084_v14 = vld [vmem:[%s4446_s6 + $0x90] sm:$0xff]  ;;  %v2075_v22 = vld [vmem:[%s4446_s6 + $0x48] sm:$0xff] }
 0x467   : > { %2137 = vmatpush.msra.mxu2 %v2086_v30  ;;  %v2878_v30 = vld [vmem:[%s4447_s7 + $0xa8] sm:$0xff] }
 0x469   : > { %v1835_v15 = vpop.f32.mrf.mxu1  ;;  %2138 = vmatpush.msra.mxu2 %v2085_v13  ;;  %v2875_v13 = vld [vmem:[%s4447_s7 + $0xa0] sm:$0x1] }
 0x46a   : > { %v1864_v23 = vadd.f32 %v1835_v15, %v1798_v7  ;;  %v1902_v11 = vpop.f32.mrf.mxu0  ;;  %v2083_v15 = vld [vmem:[%s4446_s6 + $0x88] sm:$0xff] }
 0x46b   : > { %v1728_v3 = vpop.f32.mrf.mxu3  ;;  %2139 = vmatpush.msra.mxu2 %v2084_v14  ;;  %v2892_v14 = vld [vmem:[%s4447_s7 + $0x108] sm:$0xff] }
 0x46c   : > { %v1931_v9 = vadd.f32 %v1902_v11, %v1864_v23  ;;  %v1734_v38 = vadd.f32 %v1728_v3, %v1667_v53  ;;  %v2079_v23 = vld [vmem:[%s4446_s6 + $0x68] sm:$0xff]  ;;  %v2077_v11 = vld [vmem:[%s4446_s6 + $0x58] sm:$0xff]  ;;  %v2155_v53 = vld [vmem:[%s4447_s7 + $0x30] sm:$0x1] }
 0x46d   : > { %2140 = vmatpush.msra.mxu2 %v2083_v15  ;;  %2105 = vmatpush.msra.mxu0 %v2079_v23  ;;  %v2920_v15 = vld [vmem:[%s4447_s7 + $0x1b8] sm:$0x1]  ;;  %v2889_v23 = vld [vmem:[%s4447_s7 + $0xf0] sm:$0xff] }
 0x46e   : > { %v1925_v21 = vpop.f32.mrf.mxu2  ;;  %v1801_v55 = vadd.f32 %v1795_v18, %v1734_v38  ;;  %2867 = vmatpush.msk.msrb.mxu3 %vm2169_vm2, %v2155_v53 }
 0x46f   : > { %2141 = vmatpush.msra.mxu2 %v2082_v31  ;;  %2106 = vmatpush.msra.mxu0 %v2078_v35  ;;  %v2917_v31 = vld [vmem:[%s4447_s7 + $0x1a0] sm:$0xff]  ;;  %v2938_v35 = vld [vmem:[%s4447_s7 + $0x228] sm:$0x1] }
 0x471   : > { %v1838_v27 = vpop.f32.mrf.mxu1  ;;  %2107 = vmatpush.msra.mxu0 %v2077_v11  ;;  %v2871_v11 = vld [vmem:[%s4447_s7 + $0x80] sm:$0xff] }
 0x472   : > { %v1866_v16 = vadd.f32 %v1838_v27, %v1800_v32  ;;  %v1905_v24 = vpop.f32.mrf.mxu0  ;;  %v2884_v32 = vld [vmem:[%s4447_s7 + $0xd8] sm:$0x1] }
 0x473   : > { %v1858_v57 = vpop.f32.mrf.mxu3  ;;  %2108 = vmatpush.msra.mxu0 %v2076_v40  ;;  %2885 = vmatpush.msk.msrb.mxu2 %vm2169_vm2, %v2884_v32  ;;  %v2888_v40 = vld [vmem:[%s4447_s7 + $0xe8] sm:$0xff]  ;;  %v2929_v32 = vld [vmem:[%s4447_s7 + $0x1f0] sm:$0x1] }
 0x474   : > { %v1865_v12 = vadd.f32 %v1858_v57, %v1799_v1  ;;  %v1933_v33 = vadd.f32 %v1905_v24, %v1866_v16  ;;  %v2066_v1 = vld [vmem:[%s4446_s6] sm:$0xff] }
 0x475   : > { %2109 = vmatpush.msra.mxu0 %v2075_v22  ;;  %v2916_v22 = vld [vmem:[%s4447_s7 + $0x198] sm:$0xff] }
 0x476   : > { %v1932_v8 = vadd.f32 %v1925_v21, %v1865_v12  ;;  %v1928_v51 = vpop.f32.mrf.mxu2  ;;  %v2864_v12 = vld [vmem:[%s4447_s7 + $0x68] sm:$0x1] }
 0x477   : > { %2865 = vmatpush.msk.msra.mxu1 %vm2169_vm2, %v2864_v12 }
 0x479   : > { %v1969_v34 = vpop.f32.mrf.mxu1 }
 0x47a   : > { %v1998_v48 = vadd.f32 %v1969_v34, %v1931_v9  ;;  %v2074_v9 = vld [vmem:[%s4446_s6 + $0x40] sm:$0xff]  ;;  %v2073_v34 = vld [vmem:[%s4446_s6 + $0x38] sm:$0xff] }
 0x47b   : > { %v1861_v39 = vpop.f32.mrf.mxu3  ;;  %2110 = vmatpush.msra.mxu0 %v2074_v9  ;;  %v2937_v9 = vld [vmem:[%s4447_s7 + $0x220] sm:$0xff] }
 0x47c   : > { %v2014_v20 = vadd.f32 %v2007_v2, %v1998_v48  ;;  %v1867_v58 = vadd.f32 %v1861_v39, %v1801_v55  ;;  %v2070_v48 = vld [vmem:[%s4446_s6 + $0x20] sm:$0xff]  ;;  %v2068_v39 = vld [vmem:[%s4446_s6 + $0x10] sm:$0xff] }
 0x47d   : > { %2111 = vmatpush.msra.mxu0 %v2073_v34  ;;  %v2870_v34 = vld [vmem:[%s4447_s7 + $0x78] sm:$0xff] }
 0x47e   : > { %v2018_v19 = vmax.f32 %v2014_v20, 0.0  ;;  %v1934_v59 = vadd.f32 %v1928_v51, %v1867_v58  ;;  %v2153_v58 = vld [vmem:[%s4447_s7 + $0x20] sm:$0xff]  ;;  %v2862_v51 = vld [vmem:[%s4447_s7 + $0x58] sm:$0xff] }
 0x47f   : > { %2112 = vmatpush.msra.mxu0 %v2072_v17  ;;  %v2887_v17 = vld [vmem:[%s4447_s7 + $0xe0] sm:$0xff] }
 0x480   : > { %2026 = vrot.lane.b32.xlu2 %v2018_v19, %s3222_s23 }
 0x481   : > { %v1972_v50 = vpop.f32.mrf.mxu1  ;;  %2113 = vmatpush.msra.mxu0 %v2071_v44  ;;  %v2915_v44 = vld [vmem:[%s4447_s7 + $0x190] sm:$0xff] }
 0x482   : > { %v2000_v47 = vadd.f32 %v1972_v50, %v1933_v33  ;;  %v2863_v33 = vld [vmem:[%s4447_s7 + $0x60] sm:$0xff] }
 0x483   : > { %v1992_v45 = vpop.f32.mrf.mxu3  ;;  %2114 = vmatpush.msra.mxu0 %v2070_v48  ;;  %2183 = vmatpush.msra.mxu1 %v2863_v33  ;;  %v2936_v48 = vld [vmem:[%s4447_s7 + $0x218] sm:$0xff]  ;;  %v2927_v33 = vld [vmem:[%s4447_s7 + $0x1e0] sm:$0xff] }
 0x484   : > { %v1999_v46 = vadd.f32 %v1992_v45, %v1932_v8  ;;  %v2016_v61 = vadd.f32 %v2012_v60, %v2000_v47  ;;  %v2152_v47 = vld [vmem:[%s4447_s7 + $0x18] sm:$0xff] }
 0x485   : > { %2184 = vmatpush.msra.mxu1 %v2862_v51  ;;  %v2973_v51 = vld [vmem:[%s4447_s7 + $0x300] sm:$0xff] }
 0x486   : > { %v2015_v42 = vadd.f32 %v2007_v2, %v1999_v46  ;;  %v2020_v54 = vmax.f32 %v2016_v61, 0.0  ;;  %v2069_v2 = vld [vmem:[%s4446_s6 + $0x18] sm:$0xff]  ;;  %v2902_v61 = vld [vmem:[%s4447_s7 + $0x148] sm:$0x1] }
 0x487   : > { %2115 = vmatpush.msra.mxu0 %v2069_v2  ;;  %v2869_v2 = vld [vmem:[%s4447_s7 + $0x70] sm:$0xff] }
 0x488   : > { %v2019_v41 = vmax.f32 %v2015_v42, 0.0  ;;  %v2883_v42 = vld [vmem:[%s4447_s7 + $0xd0] sm:$0xff] }
 0x489   : > { %2116 = vmatpush.msra.mxu0 %v2068_v39  ;;  %2277 = vmatpush.msrb.mxu2 %v2883_v42  ;;  %v2914_v39 = vld [vmem:[%s4447_s7 + $0x188] sm:$0xff]  ;;  %v2909_v42 = vld [vmem:[%s4447_s7 + $0x170] sm:$0xff] }
 0x48a   : > { %2028 = vrot.lane.b32.xlu1 %v2019_v41, %s3222_s23 }
 0x48b   : > { %v1995_v36 = vpop.f32.mrf.mxu3  ;;  %2117 = vmatpush.msra.mxu0 %v2067_v43  ;;  %v2935_v43 = vld [vmem:[%s4447_s7 + $0x210] sm:$0xff] }
 0x48c   : > { %v2001_v0 = vadd.f32 %v1995_v36, %v1934_v59  ;;  %v2861_v59 = vld [vmem:[%s4447_s7 + $0x50] sm:$0xff]  ;;  %v2881_v36 = vld [vmem:[%s4447_s7 + $0xc0] sm:$0xff] }
 0x48d   : > { %2118 = vmatpush.msra.mxu0 %v2066_v1  ;;  %2185 = vmatpush.msra.mxu1 %v2861_v59  ;;  %v2934_v1 = vld [vmem:[%s4447_s7 + $0x208] sm:$0xff] }
 0x48e   : > { %v2017_v52 = vadd.f32 %v2012_v60, %v2001_v0  ;;  %v2151_v60 = vld [vmem:[%s4447_s7 + $0x10] sm:$0xff]  ;;  %v2860_v0 = vld [vmem:[%s4447_s7 + $0x48] sm:$0xff] }
 0x48f   : > { %2903 = vmatpush.msk.msrb.mxu0 %vm2169_vm2, %v2902_v61  ;;  %2186 = vmatpush.msra.mxu1 %v2860_v0  ;;  %v2908_v59 = vld [vmem:[%s4447_s7 + $0x168] sm:$0xff]  ;;  %v2953_v61 = vld [vmem:[%s4447_s7 + $0x280] sm:$0xff] }
 0x490   : > { %v2021_v4 = vmax.f32 %v2017_v52, 0.0  ;;  %v2150_v52 = vld [vmem:[%s4447_s7 + $0x8] sm:$0xff] }
 0x491   : > { %2187 = vmatpush.msra.mxu1 %v2859_v6 }
 0x492   : > { %2032 = vrot.lane.b32.xlu0 %v2021_v4, %s3222_s23  ;;  %2030 = vrot.lane.b32.xlu1 %v2020_v54, %s3222_s23  ;;  %s2723_s23 = sshll.u32 %s339_s14, 4  ;;  %s2724_s23 = int_to_ptr.vmem [resolvable:$true] %s2723_s23 }
 0x493   : > { %2188 = vmatpush.msra.mxu1 %v2858_v5  ;;  %v2906_v5 = vld [vmem:[%s4447_s7 + $0x158] sm:$0xff] }
 0x495   : > { %2876 = vmatpush.msk.msrb.mxu1 %vm2169_vm2, %v2875_v13  ;;  %v2965_v13 = vld [vmem:[%s4447_s7 + $0x2d0] sm:$0x1] }
 0x4da   : > { %v2027_v3 = vpop.permute.xlu2 %2026 }
 0x4fc   : > { %v2029_v29 = vpop.permute.xlu1 %2028 }
 0x4fd   : > { %v2034_v25 = vsel %vm412_vm0, %v2027_v3, %v2029_v29  ;;  %v2041_v26 = vmax.f32 %v2019_v41, %v2029_v29  ;;  %v2882_v41 = vld [vmem:[%s4447_s7 + $0xc8] sm:$0xff]  ;;  %v2874_v3 = vld [vmem:[%s4447_s7 + $0x98] sm:$0xff] }
 0x4fe   : > { %v2040_v7 = vmax.f32 %v2018_v19, %v2034_v25  ;;  %v2154_v19 = vld [vmem:[%s4447_s7 + $0x28] sm:$0xff]  ;;  %2278 = vmatpush.msrb.mxu2 %v2882_v41  ;;  %v2891_v25 = vld [vmem:[%s4447_s7 + $0x100] sm:$0xff]  ;;  %2242 = vmatpush.msrb.mxu1 %v2874_v3 }
 0x4ff   : > { %2050 = vrot.lane.b32.xlu2 %v2041_v26, %s4454_s17  ;;  %2208 = vmatpush.msrb.mxu3 %v2154_v19  ;;  %v2898_v29 = vld [vmem:[%s4447_s7 + $0x128] sm:$0xff] }
 0x500   : > { %2048 = vrot.lane.b32.xlu0 %v2040_v7, %s4454_s17  ;;  %2279 = vmatpush.msrb.mxu2 %v2881_v36  ;;  %v2954_v41 = vld [vmem:[%s4447_s7 + $0x288] sm:$0xff]  ;;  %v2925_v36 = vld [vmem:[%s4447_s7 + $0x1d0] sm:$0xff] }
 0x501   : > { %2209 = vmatpush.msrb.mxu3 %v2153_v58  ;;  %v2955_v58 = vld [vmem:[%s4447_s7 + $0x290] sm:$0xff]  ;;  %v2950_v3 = vld [vmem:[%s4447_s7 + $0x268] sm:$0xff] }
 0x503   : > { %2210 = vmatpush.msrb.mxu3 %v2152_v47  ;;  %v2926_v47 = vld [vmem:[%s4447_s7 + $0x1d8] sm:$0xff] }
 0x504   : > { %v2033_v27 = vpop.permute.xlu0 %2032  ;;  %v2031_v28 = vpop.permute.xlu1 %2030 }
 0x505   : > { %v2043_v18 = vmax.f32 %v2021_v4, %v2033_v27  ;;  %v2035_v57 = vsel %vm412_vm0, %v2031_v28, %v2033_v27  ;;  %vm2092_vm0 = vcmask 629760   ;;  %2211 = vmatpush.msrb.mxu3 %v2151_v60  ;;  %v2880_v4 = vld [vmem:[%s4447_s7 + $0xb8] sm:$0xff]  ;;  %v2897_v27 = vld [vmem:[%s4447_s7 + $0x120] sm:$0xff] }
 0x506   : > { %v2042_v37 = vmax.f32 %v2020_v54, %v2035_v57  ;;  %v2901_v54 = vld [vmem:[%s4447_s7 + $0x140] sm:$0xff]  ;;  %2280 = vmatpush.msrb.mxu2 %v2880_v4  ;;  %v2890_v28 = vld [vmem:[%s4447_s7 + $0xf8] sm:$0xff]  ;;  %v2872_v57 = vld [vmem:[%s4447_s7 + $0x88] sm:$0xff] }
 0x507   : > { %2054 = vrot.lane.b32.xlu1 %v2043_v18, %s4454_s17  ;;  %2347 = vmatpush.msrb.mxu0 %v2901_v54  ;;  %v2907_v4 = vld [vmem:[%s4447_s7 + $0x160] sm:$0xff] }
 0x508   : > { %2052 = vrot.lane.b32.xlu2 %v2042_v37, %s4454_s17  ;;  %2212 = vmatpush.msrb.mxu3 %v2150_v52  ;;  %s2713_s17 = scalar_lea.sflag [#allocation4], %s338_s25 }
 0x509   : > { %2348 = vmatpush.msrb.mxu0 %v2900_v63  ;;  %2281 = vmatpush.msrb.mxu2 %v2879_v56  ;;  %v2952_v56 = vld [vmem:[%s4447_s7 + $0x278] sm:$0xff] }
 0x50a   : > { %2213 = vmatpush.msrb.mxu3 %v2149_v62  ;;  %v2924_v62 = vld [vmem:[%s4447_s7 + $0x1c8] sm:$0xff] }
 0x50b   : > { %2349 = vmatpush.msrb.mxu0 %v2899_v49  ;;  %2282 = vmatpush.msrb.mxu2 %v2878_v30  ;;  %v2923_v49 = vld [vmem:[%s4447_s7 + $0x1c0] sm:$0xff]  ;;  %v2951_v30 = vld [vmem:[%s4447_s7 + $0x270] sm:$0xff] }
 0x50c   : > { %2894 = vmatpush.msk.msra.mxu3 %vm2169_vm2, %v2893_v10  ;;  %v2972_v10 = vld [vmem:[%s4447_s7 + $0x2f8] sm:$0xff] }
 0x50d   : > { %2350 = vmatpush.msrb.mxu0 %v2898_v29  ;;  %v2947_v29 = vld [vmem:[%s4447_s7 + $0x260] sm:$0x1] }
 0x50e   : > { %2312 = vmatpush.msra.mxu3 %v2892_v14 }
 0x50f   : > { %2351 = vmatpush.msrb.mxu0 %v2897_v27  ;;  %v2946_v27 = vld [vmem:[%s4447_s7 + $0x258] sm:$0xff] }
 0x510   : > { %2313 = vmatpush.msra.mxu3 %v2891_v25  ;;  %v2964_v25 = vld [vmem:[%s4447_s7 + $0x2c8] sm:$0xff] }
 0x512   : > { %2314 = vmatpush.msra.mxu3 %v2890_v28  ;;  %v2963_v28 = vld [vmem:[%s4447_s7 + $0x2c0] sm:$0xff] }
 0x514   : > { %2315 = vmatpush.msra.mxu3 %v2889_v23 }
 0x516   : > { %2316 = vmatpush.msra.mxu3 %v2888_v40  ;;  %v2990_v40 = vld [vmem:[%s4447_s7 + $0x368] sm:$0xff] }
 0x518   : > { %2317 = vmatpush.msra.mxu3 %v2887_v17  ;;  %v2989_v17 = vld [vmem:[%s4447_s7 + $0x360] sm:$0xff] }
 0x559   : > { %v2051_v20 = vpop.permute.xlu2 %2050 }
 0x55a   : > { %v2063_v21 = vmax.f32 %v2041_v26, %v2051_v20  ;;  %v2919_v26 = vld [vmem:[%s4447_s7 + $0x1b0] sm:$0xff] }
 0x55c   : > { %2856 = vmatmul.msk.f32.vlgmr.msra.gmra.mxu2 %vm2092_vm0, %v2063_v21  ;;  %v2932_v21 = vld [vmem:[%s4447_s7 + $0x1f8] sm:$0xff] }
 0x55d   : > { %2921 = vmatpush.msk.msra.mxu2 %vm2169_vm2, %v2920_v15  ;;  %v2905_v15 = vld [vmem:[%s4447_s7 + $0x150] sm:$0xff] }
 0x55f   : > { %2417 = vmatpush.msra.mxu2 %v2919_v26  ;;  %v2971_v26 = vld [vmem:[%s4447_s7 + $0x2f0] sm:$0xff] }
 0x562   : > { %v2053_v24 = vpop.permute.xlu2 %2052 }
 0x572   : > { %v2049_v38 = vpop.permute.xlu0 %2048 }
 0x573   : > { %v2056_v16 = vsel %vm1608_vm11, %v2049_v38, %v2051_v20  ;;  %v2933_v20 = vld [vmem:[%s4447_s7 + $0x200] sm:$0xff] }
 0x574   : > { %v2062_v8 = vmax.f32 %v2040_v7, %v2056_v16  ;;  %v2873_v7 = vld [vmem:[%s4447_s7 + $0x90] sm:$0xff] }
 0x575   : > { %2243 = vmatpush.msrb.mxu1 %v2873_v7  ;;  %v2992_v7 = vld [vmem:[%s4447_s7 + $0x378] sm:$0x1] }
 0x576   : > { %2119 = vmatmul.f32.vlgmr.msra.gmra.mxu0 %v2062_v8 }
 0x577   : > { %2244 = vmatpush.msrb.mxu1 %v2872_v57  ;;  %v2991_v57 = vld [vmem:[%s4447_s7 + $0x370] sm:$0xff] }
 0x579   : > { %v2055_v45 = vpop.permute.xlu1 %2054  ;;  %2245 = vmatpush.msrb.mxu1 %v2871_v11  ;;  %v2969_v11 = vld [vmem:[%s4447_s7 + $0x2e0] sm:$0xff] }
 0x57a   : > { %v2057_v55 = vsel %vm1608_vm11, %v2053_v24, %v2055_v45  ;;  %v2065_v46 = vmax.f32 %v2043_v18, %v2055_v45  ;;  %v2918_v18 = vld [vmem:[%s4447_s7 + $0x1a8] sm:$0xff]  ;;  %v2911_v24 = vld [vmem:[%s4447_s7 + $0x180] sm:$0x1] }
 0x57b   : > { %v2064_v50 = vmax.f32 %v2042_v37, %v2057_v55  ;;  %v2896_v37 = vld [vmem:[%s4447_s7 + $0x118] sm:$0xff]  ;;  %2418 = vmatpush.msra.mxu2 %v2918_v18  ;;  %2246 = vmatpush.msrb.mxu1 %v2870_v34  ;;  %v2928_v45 = vld [vmem:[%s4447_s7 + $0x1e8] sm:$0xff] }
 0x57c   : > { %2857 = vmatmul.msk.f32.gmra.mxu2 %vm2092_vm0, %v2065_v46  ;;  %2352 = vmatpush.msrb.mxu0 %v2896_v37  ;;  %v2956_v55 = vld [vmem:[%s4447_s7 + $0x298] sm:$0x1]  ;;  %v2970_v18 = vld [vmem:[%s4447_s7 + $0x2e8] sm:$0xff] }
 0x57d   : > { %2419 = vmatpush.msra.mxu2 %v2917_v31  ;;  %2247 = vmatpush.msrb.mxu1 %v2869_v2  ;;  %v2910_v46 = vld [vmem:[%s4447_s7 + $0x178] sm:$0xff]  ;;  %v2945_v31 = vld [vmem:[%s4447_s7 + $0x250] sm:$0xff]  ;;  %v2960_v2 = vld [vmem:[%s4447_s7 + $0x2a8] sm:$0xff] }
 0x57e   : > { %2122 = vmatmul.f32.gmra.mxu0 %v2064_v50  ;;  %v2974_v50 = vld [vmem:[%s4447_s7 + $0x308] sm:$0x1]  ;;  %v2968_v34 = vld [vmem:[%s4447_s7 + $0x2d8] sm:$0xff] }
 0x57f   : > { %2939 = vmatpush.msk.msra.mxu0 %vm2169_vm2, %v2938_v35  ;;  %2420 = vmatpush.msra.mxu2 %v2916_v22  ;;  %v2962_v35 = vld [vmem:[%s4447_s7 + $0x2b8] sm:$0xff]  ;;  %v2944_v22 = vld [vmem:[%s4447_s7 + $0x248] sm:$0xff] }
 0x581   : > { %2487 = vmatpush.msra.mxu0 %v2937_v9  ;;  %2421 = vmatpush.msra.mxu2 %v2915_v44  ;;  %v2961_v9 = vld [vmem:[%s4447_s7 + $0x2b0] sm:$0xff]  ;;  %v2943_v44 = vld [vmem:[%s4447_s7 + $0x240] sm:$0xff] }
 0x583   : > { %2488 = vmatpush.msra.mxu0 %v2936_v48  ;;  %2422 = vmatpush.msra.mxu2 %v2914_v39  ;;  %v2988_v39 = vld [vmem:[%s4447_s7 + $0x358] sm:$0xff] }
 0x585   : > { %2489 = vmatpush.msra.mxu0 %v2935_v43  ;;  %v2942_v43 = vld [vmem:[%s4447_s7 + $0x238] sm:$0xff] }
 0x587   : > { %2490 = vmatpush.msra.mxu0 %v2934_v1  ;;  %v2959_v1 = vld [vmem:[%s4447_s7 + $0x2a0] sm:$0xff] }
 0x589   : > { %2491 = vmatpush.msra.mxu0 %v2933_v20  ;;  %v2987_v20 = vld [vmem:[%s4447_s7 + $0x350] sm:$0xff] }
 0x58b   : > { %2492 = vmatpush.msra.mxu0 %v2932_v21  ;;  %v2941_v21 = vld [vmem:[%s4447_s7 + $0x230] sm:$0xff] }
 0x5df   : > { %v2143_v53 = vpop.f32.mrf.mxu2 }
 0x5f3   : > { %v2120_v12 = vpop.f32.mrf.mxu0 }
 0x5f4   : > { %v4193_v19 = vadd.f32 %v2143_v53, %v2120_v12  ;;  %v2986_v12 = vld [vmem:[%s4447_s7 + $0x348] sm:$0xff] }
 0x5f6   : > { %2868 = vmatmul.msk.f32.vlgmr.msrb.gmra.mxu3 %vm2166_vm3, %v4193_v19  ;;  %v2165_v38 = vrot.slane %v4193_v19, 1  ;;  %v2261_v16 = vrot.slane %v4193_v19, 3  ;;  %v2331_v8 = vrot.slane %v4193_v19, 5  ;;  %v2296_v60 = vrot.slane %v4193_v19, 4 }
 0x5f7   : > { %2930 = vmatpush.msk.msrb.mxu3 %vm2169_vm2, %v2929_v32  ;;  %v2226_v54 = vrot.slane %v4193_v19, 2  ;;  %v2401_v6 = vrot.slane %v4193_v19, 7  ;;  %v2366_v37 = vrot.slane %v4193_v19, 6  ;;  %v2983_v32 = vld [vmem:[%s4447_s7 + $0x340] sm:$0x1] }
 0x5f8   : > { %2866 = vmatmul.msk.f32.vlgmr.msra.gmra.mxu1 %vm2166_vm3, %v2165_v38  ;;  %2886 = vmatmul.msk.f32.vlgmr.msrb.gmra.mxu2 %vm2166_vm3, %v2261_v16  ;;  %v2982_v16 = vld [vmem:[%s4447_s7 + $0x338] sm:$0xff] }
 0x5f9   : > { %2904 = vmatmul.msk.f32.vlgmr.msrb.gmra.mxu0 %vm2166_vm3, %v2331_v8  ;;  %2912 = vmatpush.msk.msra.mxu1 %vm2169_vm2, %v2911_v24  ;;  %v2981_v8 = vld [vmem:[%s4447_s7 + $0x330] sm:$0xff]  ;;  %v2980_v24 = vld [vmem:[%s4447_s7 + $0x328] sm:$0xff] }
 0x5fa   : > { %2452 = vmatpush.msrb.mxu3 %v2928_v45  ;;  %2957 = vmatpush.msk.msrb.mxu2 %vm2169_vm2, %v2956_v55  ;;  %v2979_v45 = vld [vmem:[%s4447_s7 + $0x320] sm:$0xff]  ;;  %v2978_v55 = vld [vmem:[%s4447_s7 + $0x318] sm:$0xff] }
 0x5fb   : > { %2382 = vmatpush.msra.mxu1 %v2910_v46  ;;  %2975 = vmatpush.msk.msrb.mxu0 %vm2169_vm2, %v2974_v50  ;;  %v2123_v0 = vpop.f32.mrf.mxu0  ;;  %v2977_v46 = vld [vmem:[%s4447_s7 + $0x310] sm:$0xff] }
 0x5fc   : > { %2453 = vmatpush.msrb.mxu3 %v2927_v33  ;;  %2557 = vmatpush.msrb.mxu2 %v2955_v58 }
 0x5fd   : > { %2383 = vmatpush.msra.mxu1 %v2909_v42  ;;  %2627 = vmatpush.msrb.mxu0 %v2973_v51 }
 0x5fe   : > { %2454 = vmatpush.msrb.mxu3 %v2926_v47  ;;  %2558 = vmatpush.msrb.mxu2 %v2954_v41 }
 0x5ff   : > { %2895 = vmatmul.msk.f32.vlgmr.msra.gmra.mxu3 %vm2166_vm3, %v2296_v60  ;;  %2384 = vmatpush.msra.mxu1 %v2908_v59  ;;  %v2146_v52 = vpop.f32.mrf.mxu2 }
 0x600   : > { %2455 = vmatpush.msrb.mxu3 %v2925_v36  ;;  %2559 = vmatpush.msrb.mxu2 %v2953_v61  ;;  %v4262_v63 = vadd.f32 %v2146_v52, %v2123_v0 }
 0x601   : > { %2877 = vmatmul.msk.f32.vlgmr.msrb.gmra.mxu1 %vm2166_vm3, %v2226_v54  ;;  %2922 = vmatmul.msk.f32.vlgmr.msra.gmra.mxu2 %vm2166_vm3, %v2401_v6 }
 0x602   : > { %2385 = vmatpush.msra.mxu1 %v2907_v4  ;;  %2456 = vmatpush.msrb.mxu3 %v2924_v62  ;;  %v2471_v14 = vrot.slane %v4262_v63, 1  ;;  %v2541_v23 = vrot.slane %v4262_v63, 3  ;;  %v2611_v48 = vrot.slane %v4262_v63, 5  ;;  %v2576_v53 = vrot.slane %v4262_v63, 4 }
 0x603   : > { %2560 = vmatpush.msrb.mxu2 %v2952_v56  ;;  %2628 = vmatpush.msrb.mxu0 %v2972_v10  ;;  %v2506_v19 = vrot.slane %v4262_v63, 2  ;;  %v2681_v38 = vrot.slane %v4262_v63, 7  ;;  %v2646_v50 = vrot.slane %v4262_v63, 6 }
 0x604   : > { %2386 = vmatpush.msra.mxu1 %v2906_v5  ;;  %2457 = vmatpush.msrb.mxu3 %v2923_v49 }
 0x605   : > { %2561 = vmatpush.msrb.mxu2 %v2951_v30  ;;  %2940 = vmatmul.msk.f32.vlgmr.msra.gmra.mxu0 %vm2166_vm3, %v2471_v14 }
 0x606   : > { %2966 = vmatpush.msk.msra.mxu3 %vm2169_vm2, %v2965_v13  ;;  %2387 = vmatpush.msra.mxu1 %v2905_v15 }
 0x607   : > { %2562 = vmatpush.msrb.mxu2 %v2950_v3  ;;  %2629 = vmatpush.msrb.mxu0 %v2971_v26 }
 0x608   : > { %2948 = vmatpush.msk.msrb.mxu1 %vm2169_vm2, %v2947_v29  ;;  %2592 = vmatpush.msra.mxu3 %v2964_v25 }
 0x609   : > { %2993 = vmatpush.msk.msra.mxu2 %vm2169_vm2, %v2992_v7  ;;  %2931 = vmatmul.msk.f32.vlgmr.msrb.gmra.mxu3 %vm2166_vm3, %v4262_v63 }
 0x60a   : > { %2522 = vmatpush.msrb.mxu1 %v2946_v27  ;;  %2593 = vmatpush.msra.mxu3 %v2963_v28  ;;  %v2708_v27 = vld [vmem:[%s4448_s8] sm:$0x1] }
 0x60b   : > { %2630 = vmatpush.msrb.mxu0 %v2970_v18  ;;  %2697 = vmatpush.msra.mxu2 %v2991_v57 }
 0x60c   : > { %2913 = vmatmul.msk.f32.vlgmr.msra.gmra.mxu1 %vm2166_vm3, %v2366_v37  ;;  %2958 = vmatmul.msk.f32.vlgmr.msrb.gmra.mxu2 %vm2166_vm3, %v2541_v23 }
 0x60d   : > { %2523 = vmatpush.msrb.mxu1 %v2945_v31  ;;  %2594 = vmatpush.msra.mxu3 %v2962_v35 }
 0x60e   : > { %2631 = vmatpush.msrb.mxu0 %v2969_v11  ;;  %2698 = vmatpush.msra.mxu2 %v2990_v40 }
 0x60f   : > { %2524 = vmatpush.msrb.mxu1 %v2944_v22  ;;  %2595 = vmatpush.msra.mxu3 %v2961_v9 }
 0x610   : > { %2632 = vmatpush.msrb.mxu0 %v2968_v34  ;;  %2699 = vmatpush.msra.mxu2 %v2989_v17 }
 0x611   : > { %2976 = vmatmul.msk.f32.vlgmr.msrb.gmra.mxu0 %vm2166_vm3, %v2611_v48  ;;  %2525 = vmatpush.msrb.mxu1 %v2943_v44 }
 0x612   : > { %2596 = vmatpush.msra.mxu3 %v2960_v2  ;;  %2700 = vmatpush.msra.mxu2 %v2988_v39 }
 0x613   : > { %2526 = vmatpush.msrb.mxu1 %v2942_v43 }
 0x614   : > { %2597 = vmatpush.msra.mxu3 %v2959_v1  ;;  %2701 = vmatpush.msra.mxu2 %v2987_v20 }
 0x615   : > { %2967 = vmatmul.msk.f32.vlgmr.msra.gmra.mxu3 %vm2166_vm3, %v2576_v53  ;;  %2527 = vmatpush.msrb.mxu1 %v2941_v21 }
 0x616   : > { %2702 = vmatpush.msra.mxu2 %v2986_v12  ;;  %2949 = vmatmul.msk.f32.vlgmr.msrb.gmra.mxu1 %vm2166_vm3, %v2506_v19 }
 0x617   : > { %2984 = vmatpush.msk.msra.mxu1 %vm2169_vm2, %v2983_v32  ;;  %2994 = vmatmul.msk.f32.vlgmr.msra.gmra.mxu2 %vm2166_vm3, %v2681_v38 }
 0x619   : > { %2662 = vmatpush.msra.mxu1 %v2982_v16 }
 0x61b   : > { %2663 = vmatpush.msra.mxu1 %v2981_v8 }
 0x61d   : > { %2664 = vmatpush.msra.mxu1 %v2980_v24 }
 0x61f   : > { %2665 = vmatpush.msra.mxu1 %v2979_v45 }
 0x621   : > { %2666 = vmatpush.msra.mxu1 %v2978_v55 }
 0x623   : > { %2667 = vmatpush.msra.mxu1 %v2977_v46 }
 0x624   : > { %2985 = vmatmul.msk.f32.vlgmr.msra.gmra.mxu1 %vm2166_vm3, %v2646_v50 }
 0x675   : > { %v2190_v33 = vpop.f32.mrf.mxu1 }
 0x676   : > { %v2354_v61 = vpop.f32.mrf.mxu0 }
 0x679   : > { %v2215_v58 = vpop.f32.mrf.mxu3 }
 0x67a   : > { %v2216_v42 = vadd.f32 %v2215_v58, %v2190_v33 }
 0x67b   : > { %v2284_v41 = vpop.f32.mrf.mxu2 }
 0x67e   : > { %v2249_v51 = vpop.f32.mrf.mxu1 }
 0x67f   : > { %v2252_v47 = vadd.f32 %v2249_v51, %v2216_v42 }
 0x681   : > { %v2287_v59 = vadd.f32 %v2284_v41, %v2252_v47 }
 0x682   : > { %v2319_v60 = vpop.f32.mrf.mxu3  ;;  %v2494_v56 = vpop.f32.mrf.mxu0 }
 0x683   : > { %v2322_v36 = vadd.f32 %v2319_v60, %v2287_v59 }
 0x684   : > { %v2424_v4 = vpop.f32.mrf.mxu2 }
 0x685   : > { %v2357_v0 = vadd.f32 %v2354_v61, %v2322_v36 }
 0x689   : > { %v2389_v52 = vpop.f32.mrf.mxu1 }
 0x68a   : > { %v2392_v54 = vadd.f32 %v2389_v52, %v2357_v0 }
 0x68c   : > { %v2427_v6 = vadd.f32 %v2424_v4, %v2392_v54  ;;  %v2459_v62 = vpop.f32.mrf.mxu3 }
 0x68e   : > { %v2462_v63 = vadd.f32 %v2459_v62, %v2427_v6  ;;  %v2634_v3 = vpop.f32.mrf.mxu0 }
 0x68f   : > { %v2564_v30 = vpop.f32.mrf.mxu2 }
 0x690   : > { %v2497_v10 = vadd.f32 %v2494_v56, %v2462_v63 }
 0x693   : > { %v2529_v5 = vpop.f32.mrf.mxu1 }
 0x694   : > { %v2532_v49 = vadd.f32 %v2529_v5, %v2497_v10 }
 0x696   : > { %v2567_v13 = vadd.f32 %v2564_v30, %v2532_v49 }
 0x698   : > { %v2599_v14 = vpop.f32.mrf.mxu3 }
 0x699   : > { %v2602_v15 = vadd.f32 %v2599_v14, %v2567_v13 }
 0x69a   : > { %v2704_v7 = vpop.f32.mrf.mxu2 }
 0x69b   : > { %v2637_v29 = vadd.f32 %v2634_v3, %v2602_v15 }
 0x6a1   : > { %v2669_v25 = vpop.f32.mrf.mxu1 }
 0x6a2   : > { %v2672_v26 = vadd.f32 %v2669_v25, %v2637_v29 }
 0x6a4   : > { %v2707_v28 = vadd.f32 %v2704_v7, %v2672_v26 }
 0x6a6   : > { %v2709_v18 = vadd.f32 %v2708_v27, %v2707_v28 }
 0x6a8   : > { %2711 = vst.msk [vmem:[%s339_s14] sm:$0x1] %vm2710_vm4, %v2709_v18 }
 0x6a9   : > { %3169 = shalt.err (!%p3166_p8)
}
 0x6aa   : > { %3002 = dma.vmem_to_hbm [thread:$0]  (%p3323_p5), %s2724_s23, 16, %s2726_s16, %s2713_s17  }
 0x6ab PF: > { %p3014_p9 = scmp.ge.s32.totalorder %s3208_s12, 2  ;;  %s2737_s25 = sand.u32 1, %s3196_s30  }
 0x6ac   : > { %s2738_s29 = scalar_lea.sflag [#allocation4], %s2737_s25 }
 0x6ad   : > { %p3009_p10 = pnand %p3014_p9, %p3327_p6 }
 0x6af   : > { %p3010_p11 = pneg %p3009_p10 }
 0x6b1   : > { %3191 = dma.done.wait (%p3010_p11), %s2738_s29, 16  }
 0x6b2   : > { %3193 = vsyncadd (%p3010_p11), %s2738_s29, 4294967280  ;;  %p20_p12 = scmp.ge.s32.totalorder %s3310_s15, 4   ;;  %s4455_s30 = smov %s3200_s10 }
 0x6b3   : > { %s4456_s10 = smov %s3204_s11  ;;  %s4457_s11 = smov %s3321_s18 }
 0x6b4   : > { %s4458_s12 = smov %s3310_s15  ;;  %22 = sbr.rel (!%p20_p12) target bundleno = 4 (0x4), region = 119 }
 0x6b9   :  { %2743 = vsyncpa [#allocation3], 1 }
 0x6ba   :  { %2745 = vsyncpa [#allocation3 + $0x1], 1 }
 0x6bb   :  { %2746 = vsyncpa [#allocation4], 1 }
 0x6bc   :  { %2748 = vsyncpa [#allocation4 + $0x1], 1 }

</bundles_post_ra>
